<compile_context>
chip_gen: v5e
topology: v5e:2x2
jax: 0.10.0
libtpu: 0.0.40
codegen_flags: <defaults>
</compile_context>

<pallas_src>
import functools

import jax
import jax.numpy as jnp
from jax import lax
from jax.experimental import pallas as pl
from jax.experimental.pallas import tpu as pltpu


def _round_up(n, m):
    return ((n + m - 1) // m) * m


def _coupling_kernel(
    H, W, Cin, Cmid, ns,
    # per-image activations
    x_ref,        # (1, 2*Cin, HW)   rows [:Cin]=x_id, [Cin:]=x_chg
    xcond_ref,    # (1, Ccond, HW)
    sld_ref,      # (1, 1, 1)
    # constants (constant index_map -> fetched once)
    masks_ref,    # (9, HW) f32 0/1 boundary masks per 3x3 tap
    w_cond_ref, b_cond_ref,   # fused mid_cond(1x1)+in_cond(3x3): (Cmid+Cin, 9*Ccond), (Cmid+Cin, 1)
    w_in_ref, b_in_ref,       # in_conv   : (Cmid, 9*Cin), (Cmid, 1)   (actnorm folded)
    w_m_ref, b_m_ref,         # mid_conv  : (Cmid, Cmid),  (Cmid, 1)   (actnorm folded)
    w_o_ref, b_o_ref,         # out_conv  : (ns+Cin, 9*Cmid), (ns+Cin,1) (exp(3*logs) folded)
    cpl_scale_ref,            # (Cin, 1)
    # outputs
    out_ref,      # (1, 2*Cin, HW)
    sld_out_ref,  # (1, 1, 1)
):
    HW = H * W
    x_all = x_ref[0]            # (2*Cin, HW)
    x_id = x_all[:Cin]
    x_chg = x_all[Cin:]
    x_cond = xcond_ref[0]       # (Ccond, HW)
    masks = masks_ref[...]      # (9, HW)

    def tap(x, t):
        """t-th shifted-and-masked 3x3 tap of x (C, HW); center tap is x itself."""
        if t == 4:
            return x
        off = (t // 3 - 1) * W + (t % 3 - 1)
        rolled = pltpu.roll(x, shift=(-off) % HW, axis=1)   # XLU lane rotation
        return rolled * masks[t:t + 1, :]

    def conv3x3(x, w_ref):
        """'same' 3x3 conv: x (C, HW) -> (Co, HW). Weight layout (Co, 9*C),
        column = (ky*3+kx)*C + ci.  Small C -> one fused K=9*C matmul; large C
        -> 9 accumulating K=C matmuls (bounded VMEM live set)."""
        C = x.shape[0]
        use_acc = (9 * C * HW * 4) > (64 * 1024)
        if use_acc:
            acc = jnp.dot(w_ref[:, 4 * C:5 * C], x,
                          preferred_element_type=jnp.float32)        # center tap
            for t in range(9):
                if t == 4:
                    continue
                acc = acc + jnp.dot(w_ref[:, t * C:(t + 1) * C], tap(x, t),
                                    preferred_element_type=jnp.float32)
            return acc
        patch = jnp.concatenate([tap(x, t) for t in range(9)], axis=0)   # (9*C, HW)
        return jnp.dot(w_ref[...], patch, preferred_element_type=jnp.float32)

    # Fused conditional convs: rows [:Cmid] = mid_cond (h2), rows [Cmid:] = in_cond (h0).
    hc = conv3x3(x_cond, w_cond_ref) + b_cond_ref[...]        # (Cmid+Cin, HW)
    h2 = hc[:Cmid]
    h0 = hc[Cmid:]

    # h1 = relu(actnorm(in_conv(x_id + h0)))   (actnorm folded into w/b)
    h1 = jnp.maximum(conv3x3(x_id + h0, w_in_ref) + b_in_ref[...], 0.0)   # (Cmid, HW)
    # h3 = relu(actnorm(mid_conv(h1 + h2)))    (1x1 conv == matmul)
    h3 = jnp.maximum(
        jnp.dot(w_m_ref[...], h1 + h2, preferred_element_type=jnp.float32)
        + b_m_ref[...], 0.0)                                              # (Cmid, HW)

    # Fused out_conv (Conv2dZeros, exp(3*logs) folded). Rows [:Cin] = scale
    # channels (0::2), rows [Cin:ns] = zero padding, rows [ns:ns+Cin] = translate.
    st = conv3x3(h3, w_o_ref) + b_o_ref[...]                              # (ns+Cin, HW)
    s = cpl_scale_ref[...] * jnp.tanh(st[:Cin])                           # (Cin, HW)
    t_raw = st[ns:ns + Cin]

    xchg_new = jnp.exp(s) * x_chg + t_raw
    out_ref[0] = jnp.concatenate([x_id, xchg_new], axis=0)   # passthrough + coupled half

    # per-sample log-determinant: lane reduction then sublane reduction
    ld = jnp.sum(jnp.sum(s, axis=1, keepdims=True), axis=0, keepdims=True)   # (1, 1)
    sld_out_ref[0] = sld_ref[0] + ld


def coupling_forward(x, x_cond, sld, params):
    """x:(B, 2*Cin, H, W)  x_cond:(B, Ccond, H, W)  sld:(B,)  -- NCHW like PyTorch."""
    B, C2, H, W = x.shape
    Cin = C2 // 2
    Ccond = x_cond.shape[1]
    Cmid = params["w_in"].shape[0]
    HW = H * W
    ns = _round_up(Cin, 8)   # padded size of the scale half (sublane-aligned split)

    p = {k: jnp.asarray(v, jnp.float32) for k, v in params.items()}

    def w3(w):   # (Co, Ci, 3, 3) -> (Co, 9*Ci), column = (ky*3+kx)*Ci + ci
        return jnp.transpose(w, (0, 2, 3, 1)).reshape(w.shape[0], -1)

    def col(v):
        return v.reshape(-1, 1)

    # ---- fold ActNorm / Conv2dZeros scales into weights & biases ----
    e_ic = jnp.exp(p["l_ic"]); e_in = jnp.exp(p["l_in"])
    e_mc = jnp.exp(p["l_mc"]); e_m = jnp.exp(p["l_m"])
    e_o = jnp.exp(3.0 * p["logs_out"])

    # fused cond conv: mid_cond (1x1, center tap only) stacked on top of in_cond (3x3)
    w_mc2 = (p["w_mc"] * e_mc[:, None, None, None])[:, :, 0, 0]            # (Cmid, Ccond)
    w_mc3 = jnp.zeros((Cmid, Ccond, 3, 3), jnp.float32).at[:, :, 1, 1].set(w_mc2)
    w_ic3 = p["w_ic"] * e_ic[:, None, None, None]                          # (Cin, Ccond, 3, 3)
    w_cond = w3(jnp.concatenate([w_mc3, w_ic3], axis=0))                   # (Cmid+Cin, 9*Ccond)
    b_cond = col(jnp.concatenate([p["b_mc"] * e_mc, p["b_ic"] * e_ic]))

    w_in = w3(p["w_in"] * e_in[:, None, None, None])
    b_in = col(p["b_in"] * e_in)
    w_m = (p["w_m"] * e_m[:, None, None, None])[:, :, 0, 0]
    b_m = col(p["b_m"] * e_m)

    # Conv2dZeros: fold exp(3*logs), split even/odd channels, pad scale half to `ns`
    w_o_f = p["w_out"] * e_o[:, None, None, None]
    b_o_f = p["b_out"] * e_o
    pad = ns - Cin
    w_parts = [w_o_f[0::2]]
    b_parts = [b_o_f[0::2]]
    if pad:
        w_parts.append(jnp.zeros((pad, Cmid, 3, 3), jnp.float32))
        b_parts.append(jnp.zeros((pad,), jnp.float32))
    w_parts.append(w_o_f[1::2])
    b_parts.append(b_o_f[1::2])
    w_o = w3(jnp.concatenate(w_parts, axis=0))                              # (ns+Cin, 9*Cmid)
    b_o = col(jnp.concatenate(b_parts))

    cpl = col(p["cpl_scale"])

    # ---- boundary masks for the 9 taps (hoisted out of the kernel) ----
    pid = jnp.arange(HW, dtype=jnp.int32)
    hh, ww = pid // W, pid % W
    mrows = []
    for ky in range(3):
        for kx in range(3):
            dy, dx = ky - 1, kx - 1
            mrows.append((hh + dy >= 0) & (hh + dy < H) & (ww + dx >= 0) & (ww + dx < W))
    masks = jnp.stack(mrows, axis=0).astype(jnp.float32)                    # (9, HW)

    # ---- activations: pure reshapes, no slicing / concat in the wrapper ----
    x_flat = x.reshape(B, 2 * Cin, HW).astype(jnp.float32)
    xc_flat = x_cond.reshape(B, Ccond, HW).astype(jnp.float32)
    sld_in = sld.reshape(B, 1, 1).astype(jnp.float32)

    batch3 = lambda shape: pl.BlockSpec((1,) + tuple(shape[1:]), lambda b: (b, 0, 0))
    full2 = lambda shape: pl.BlockSpec(tuple(shape), lambda b: (0, 0))

    args = [x_flat, xc_flat, sld_in, masks,
            w_cond, b_cond, w_in, b_in, w_m, b_m, w_o, b_o, cpl]
    in_specs = ([batch3(x_flat.shape), batch3(xc_flat.shape), batch3(sld_in.shape)]
                + [full2(a.shape) for a in args[3:]])

    out_shapes = (jax.ShapeDtypeStruct((B, 2 * Cin, HW), jnp.float32),
                  jax.ShapeDtypeStruct((B, 1, 1), jnp.float32))
    out_specs = (pl.BlockSpec((1, 2 * Cin, HW), lambda b: (b, 0, 0)),
                 pl.BlockSpec((1, 1, 1), lambda b: (b, 0, 0)))

    out_flat, sld_out = pl.pallas_call(
        functools.partial(_coupling_kernel, H, W, Cin, Cmid, ns),
        out_shape=out_shapes,
        grid=(B,),
        in_specs=in_specs,
        out_specs=out_specs,
        compiler_params=pltpu.CompilerParams(
            dimension_semantics=("parallel",),
            vmem_limit_bytes=64 * 1024 * 1024),
    )(*args)

    return out_flat.reshape(B, 2 * Cin, H, W), sld_out.reshape(B)


def coupling_forward_ref(x, x_cond, sld, p):
    """Pure-JAX NCHW reference mirroring the PyTorch module."""
    Cin = p["cpl_scale"].shape[0]
    x_id, x_chg = x[:, :Cin], x[:, Cin:]

    def conv(h, w, pad, b=None):
        out = lax.conv_general_dilated(
            h, w, (1, 1), [(pad, pad), (pad, pad)],
            dimension_numbers=("NCHW", "OIHW", "NCHW"),
            precision=lax.Precision.HIGHEST)
        if b is not None:
            out = out + b[None, :, None, None]
        return out

    def actnorm(y, b, l):
        return (y + b[None, :, None, None]) * jnp.exp(l)[None, :, None, None]

    h0 = actnorm(conv(x_cond, p["w_ic"], 1), p["b_ic"], p["l_ic"])
    h1 = jax.nn.relu(actnorm(conv(x_id + h0, p["w_in"], 1), p["b_in"], p["l_in"]))
    h2 = actnorm(conv(x_cond, p["w_mc"], 0), p["b_mc"], p["l_mc"])
    h3 = jax.nn.relu(actnorm(conv(h1 + h2, p["w_m"], 0), p["b_m"], p["l_m"]))
    st = conv(h3, p["w_out"], 1, p["b_out"]) * jnp.exp(3.0 * p["logs_out"])[None, :, None, None]
    scale = p["cpl_scale"][None, :, None, None] * jnp.tanh(st[:, 0::2])
    trans = st[:, 1::2]
    ld = scale.reshape(scale.shape[0], -1).sum(-1)
    x_chg_new = jnp.exp(scale) * x_chg + trans
    return jnp.concatenate([x_id, x_chg_new], axis=1), sld + ld


def init_params(key, cin, ccond, cmid):
    ks = jax.random.split(key, 15)
    n = lambda k, shape, s: s * jax.random.normal(k, shape, jnp.float32)
    return dict(
        w_ic=n(ks[0], (cin, ccond, 3, 3), 0.05),
        b_ic=n(ks[1], (cin,), 0.1),
        l_ic=n(ks[2], (cin,), 0.1),
        w_in=n(ks[3], (cmid, cin, 3, 3), 0.05),
        b_in=n(ks[4], (cmid,), 0.1),
        l_in=n(ks[5], (cmid,), 0.1),
        w_mc=n(ks[6], (cmid, ccond, 1, 1), 0.05),
        b_mc=n(ks[7], (cmid,), 0.1),
        l_mc=n(ks[8], (cmid,), 0.1),
        w_m=n(ks[9], (cmid, cmid, 1, 1), 0.05),
        b_m=n(ks[10], (cmid,), 0.1),
        l_m=n(ks[11], (cmid,), 0.1),
        w_out=n(ks[12], (2 * cin, cmid, 3, 3), 0.05),
        b_out=n(ks[13], (2 * cin,), 0.1),
        logs_out=n(ks[14], (2 * cin,), 0.1),
        cpl_scale=jnp.ones((cin,), jnp.float32),
    )


if __name__ == "__main__":
    B, Cin, Ccond, Cmid, H, W = 2, 2, 3, 8, 16, 16   # x has 2*Cin = 4 channels
    key = jax.random.PRNGKey(0)
    kx, kc, ks, kp = jax.random.split(key, 4)
    x = jax.random.normal(kx, (B, 2 * Cin, H, W), jnp.float32)
    x_cond = jax.random.normal(kc, (B, Ccond, H, W), jnp.float32)
    sld = jax.random.normal(ks, (B,), jnp.float32)
    params = init_params(kp, Cin, Ccond, Cmid)

    fwd = jax.jit(coupling_forward)
    x_out, sld_out = jax.block_until_ready(fwd(x, x_cond, sld, params))

    x_ref, sld_ref = coupling_forward_ref(x, x_cond, sld, params)
    assert x_out.shape == x.shape and sld_out.shape == sld.shape
    assert jnp.allclose(x_out, x_ref, atol=1e-3, rtol=1e-3), "x mismatch"
    assert jnp.allclose(sld_out, sld_ref, atol=1e-3, rtol=1e-3), "sld mismatch"
    print("KERNEL_OK")
</pallas_src>

<mosaic_0001>
module attributes {stable_mosaic.version = 11 : i64} {
  func.func @_coupling_kernel(%arg0: i32, %arg1: memref<1x4x256xf32, #tpu.memory_space<vmem>>, %arg2: memref<1x3x256xf32, #tpu.memory_space<vmem>>, %arg3: memref<1x1x1xf32, #tpu.memory_space<vmem>>, %arg4: memref<9x256xf32, #tpu.memory_space<vmem>>, %arg5: memref<10x27xf32, #tpu.memory_space<vmem>>, %arg6: memref<10x1xf32, #tpu.memory_space<vmem>>, %arg7: memref<8x18xf32, #tpu.memory_space<vmem>>, %arg8: memref<8x1xf32, #tpu.memory_space<vmem>>, %arg9: memref<8x8xf32, #tpu.memory_space<vmem>>, %arg10: memref<8x1xf32, #tpu.memory_space<vmem>>, %arg11: memref<10x72xf32, #tpu.memory_space<vmem>>, %arg12: memref<10x1xf32, #tpu.memory_space<vmem>>, %arg13: memref<2x1xf32, #tpu.memory_space<vmem>>, %arg14: memref<1x4x256xf32, #tpu.memory_space<vmem>>, %arg15: memref<1x1x1xf32, #tpu.memory_space<vmem>>) attributes {dimension_semantics = [#tpu.dimension_semantics<parallel>], iteration_bounds = array<i64: 2>, scalar_prefetch = 0 : i64, scratch_operands = 0 : i64, tpu.core_type = #tpu.core_type<tc>, window_params = [{transform_indices = @transform_0, window_bounds = array<i64: 1, 4, 256>}, {transform_indices = @transform_1, window_bounds = array<i64: 1, 3, 256>}, {transform_indices = @transform_2, window_bounds = array<i64: 1, 1, 1>}, {pipeline_mode = #tpu.pipeline_mode<synchronous>, transform_indices = @transform_3, window_bounds = array<i64: 9, 256>}, {pipeline_mode = #tpu.pipeline_mode<synchronous>, transform_indices = @transform_4, window_bounds = array<i64: 10, 27>}, {pipeline_mode = #tpu.pipeline_mode<synchronous>, transform_indices = @transform_5, window_bounds = array<i64: 10, 1>}, {pipeline_mode = #tpu.pipeline_mode<synchronous>, transform_indices = @transform_6, window_bounds = array<i64: 8, 18>}, {pipeline_mode = #tpu.pipeline_mode<synchronous>, transform_indices = @transform_7, window_bounds = array<i64: 8, 1>}, {pipeline_mode = #tpu.pipeline_mode<synchronous>, transform_indices = @transform_8, window_bounds = array<i64: 8, 8>}, {pipeline_mode = #tpu.pipeline_mode<synchronous>, transform_indices = @transform_9, window_bounds = array<i64: 8, 1>}, {pipeline_mode = #tpu.pipeline_mode<synchronous>, transform_indices = @transform_10, window_bounds = array<i64: 10, 72>}, {pipeline_mode = #tpu.pipeline_mode<synchronous>, transform_indices = @transform_11, window_bounds = array<i64: 10, 1>}, {pipeline_mode = #tpu.pipeline_mode<synchronous>, transform_indices = @transform_12, window_bounds = array<i64: 2, 1>}, {transform_indices = @transform_13, window_bounds = array<i64: 1, 4, 256>}, {transform_indices = @transform_14, window_bounds = array<i64: 1, 1, 1>}]} {
    %c0 = arith.constant 0 : index
    %c0_0 = arith.constant 0 : index
    %c0_1 = arith.constant 0 : index
    %0 = vector.load %arg1[%c0, %c0_0, %c0_1] : memref<1x4x256xf32, #tpu.memory_space<vmem>>, vector<1x4x256xf32>
    %1 = vector.shape_cast %0 : vector<1x4x256xf32> to vector<4x256xf32>
    %2 = vector.extract_strided_slice %1 {offsets = [0, 0], sizes = [2, 256], strides = [1, 1]} : vector<4x256xf32> to vector<2x256xf32>
    %3 = vector.extract_strided_slice %1 {offsets = [2, 0], sizes = [2, 256], strides = [1, 1]} : vector<4x256xf32> to vector<2x256xf32>
    %c0_2 = arith.constant 0 : index
    %c0_3 = arith.constant 0 : index
    %c0_4 = arith.constant 0 : index
    %4 = vector.load %arg2[%c0_2, %c0_3, %c0_4] : memref<1x3x256xf32, #tpu.memory_space<vmem>>, vector<1x3x256xf32>
    %5 = vector.shape_cast %4 : vector<1x3x256xf32> to vector<3x256xf32>
    %c0_5 = arith.constant 0 : index
    %c0_6 = arith.constant 0 : index
    %6 = vector.load %arg4[%c0_5, %c0_6] : memref<9x256xf32, #tpu.memory_space<vmem>>, vector<9x256xf32>
    %c17_i32 = arith.constant 17 : i32
    %7 = tpu.dynamic_rotate %5 by %c17_i32 dim 1 : vector<3x256xf32>, i32 -> vector<3x256xf32>
    %8 = vector.extract_strided_slice %6 {offsets = [0, 0], sizes = [1, 256], strides = [1, 1]} : vector<9x256xf32> to vector<1x256xf32>
    %9 = vector.broadcast %8 : vector<1x256xf32> to vector<3x256xf32>
    %10 = arith.mulf %7, %9 : vector<3x256xf32>
    %c16_i32 = arith.constant 16 : i32
    %11 = tpu.dynamic_rotate %5 by %c16_i32 dim 1 : vector<3x256xf32>, i32 -> vector<3x256xf32>
    %12 = vector.extract_strided_slice %6 {offsets = [1, 0], sizes = [1, 256], strides = [1, 1]} : vector<9x256xf32> to vector<1x256xf32>
    %13 = vector.broadcast %12 : vector<1x256xf32> to vector<3x256xf32>
    %14 = arith.mulf %11, %13 : vector<3x256xf32>
    %c15_i32 = arith.constant 15 : i32
    %15 = tpu.dynamic_rotate %5 by %c15_i32 dim 1 : vector<3x256xf32>, i32 -> vector<3x256xf32>
    %16 = vector.extract_strided_slice %6 {offsets = [2, 0], sizes = [1, 256], strides = [1, 1]} : vector<9x256xf32> to vector<1x256xf32>
    %17 = vector.broadcast %16 : vector<1x256xf32> to vector<3x256xf32>
    %18 = arith.mulf %15, %17 : vector<3x256xf32>
    %c1_i32 = arith.constant 1 : i32
    %19 = tpu.dynamic_rotate %5 by %c1_i32 dim 1 : vector<3x256xf32>, i32 -> vector<3x256xf32>
    %20 = vector.extract_strided_slice %6 {offsets = [3, 0], sizes = [1, 256], strides = [1, 1]} : vector<9x256xf32> to vector<1x256xf32>
    %21 = vector.broadcast %20 : vector<1x256xf32> to vector<3x256xf32>
    %22 = arith.mulf %19, %21 : vector<3x256xf32>
    %c255_i32 = arith.constant 255 : i32
    %23 = tpu.dynamic_rotate %5 by %c255_i32 dim 1 : vector<3x256xf32>, i32 -> vector<3x256xf32>
    %24 = vector.extract_strided_slice %6 {offsets = [5, 0], sizes = [1, 256], strides = [1, 1]} : vector<9x256xf32> to vector<1x256xf32>
    %25 = vector.broadcast %24 : vector<1x256xf32> to vector<3x256xf32>
    %26 = arith.mulf %23, %25 : vector<3x256xf32>
    %c241_i32 = arith.constant 241 : i32
    %27 = tpu.dynamic_rotate %5 by %c241_i32 dim 1 : vector<3x256xf32>, i32 -> vector<3x256xf32>
    %28 = vector.extract_strided_slice %6 {offsets = [6, 0], sizes = [1, 256], strides = [1, 1]} : vector<9x256xf32> to vector<1x256xf32>
    %29 = vector.broadcast %28 : vector<1x256xf32> to vector<3x256xf32>
    %30 = arith.mulf %27, %29 : vector<3x256xf32>
    %c240_i32 = arith.constant 240 : i32
    %31 = tpu.dynamic_rotate %5 by %c240_i32 dim 1 : vector<3x256xf32>, i32 -> vector<3x256xf32>
    %32 = vector.extract_strided_slice %6 {offsets = [7, 0], sizes = [1, 256], strides = [1, 1]} : vector<9x256xf32> to vector<1x256xf32>
    %33 = vector.broadcast %32 : vector<1x256xf32> to vector<3x256xf32>
    %34 = arith.mulf %31, %33 : vector<3x256xf32>
    %c239_i32 = arith.constant 239 : i32
    %35 = tpu.dynamic_rotate %5 by %c239_i32 dim 1 : vector<3x256xf32>, i32 -> vector<3x256xf32>
    %36 = vector.extract_strided_slice %6 {offsets = [8, 0], sizes = [1, 256], strides = [1, 1]} : vector<9x256xf32> to vector<1x256xf32>
    %37 = vector.broadcast %36 : vector<1x256xf32> to vector<3x256xf32>
    %38 = arith.mulf %35, %37 : vector<3x256xf32>
    %39 = tpu.concatenate %10, %14, %18, %22, %5, %26, %30, %34, %38 in 0 : vector<3x256xf32>, vector<3x256xf32>, vector<3x256xf32>, vector<3x256xf32>, vector<3x256xf32>, vector<3x256xf32>, vector<3x256xf32>, vector<3x256xf32>, vector<3x256xf32> -> vector<27x256xf32>
    %c0_7 = arith.constant 0 : index
    %c0_8 = arith.constant 0 : index
    %40 = vector.load %arg5[%c0_7, %c0_8] : memref<10x27xf32, #tpu.memory_space<vmem>>, vector<10x27xf32>
    %cst = arith.constant dense<0.000000e+00> : vector<10x256xf32>
    %41 = tpu.matmul %40, %39, %cst {dimension_numbers = #tpu.dot_dimension_numbers<[1], [0], [0], [1], [0, 0, 1, 1], [], []>} : vector<10x27xf32>, vector<27x256xf32>, vector<10x256xf32> -> vector<10x256xf32>
    %c0_9 = arith.constant 0 : index
    %c0_10 = arith.constant 0 : index
    %42 = vector.load %arg6[%c0_9, %c0_10] : memref<10x1xf32, #tpu.memory_space<vmem>>, vector<10x1xf32>
    %43 = vector.broadcast %42 : vector<10x1xf32> to vector<10x256xf32>
    %44 = arith.addf %41, %43 : vector<10x256xf32>
    %45 = vector.extract_strided_slice %44 {offsets = [0, 0], sizes = [8, 256], strides = [1, 1]} : vector<10x256xf32> to vector<8x256xf32>
    %46 = vector.extract_strided_slice %44 {offsets = [8, 0], sizes = [2, 256], strides = [1, 1]} : vector<10x256xf32> to vector<2x256xf32>
    %47 = arith.addf %2, %46 : vector<2x256xf32>
    %c17_i32_11 = arith.constant 17 : i32
    %48 = tpu.dynamic_rotate %47 by %c17_i32_11 dim 1 : vector<2x256xf32>, i32 -> vector<2x256xf32>
    %49 = vector.extract_strided_slice %6 {offsets = [0, 0], sizes = [1, 256], strides = [1, 1]} : vector<9x256xf32> to vector<1x256xf32>
    %50 = vector.broadcast %49 : vector<1x256xf32> to vector<2x256xf32>
    %51 = arith.mulf %48, %50 : vector<2x256xf32>
    %c16_i32_12 = arith.constant 16 : i32
    %52 = tpu.dynamic_rotate %47 by %c16_i32_12 dim 1 : vector<2x256xf32>, i32 -> vector<2x256xf32>
    %53 = vector.extract_strided_slice %6 {offsets = [1, 0], sizes = [1, 256], strides = [1, 1]} : vector<9x256xf32> to vector<1x256xf32>
    %54 = vector.broadcast %53 : vector<1x256xf32> to vector<2x256xf32>
    %55 = arith.mulf %52, %54 : vector<2x256xf32>
    %c15_i32_13 = arith.constant 15 : i32
    %56 = tpu.dynamic_rotate %47 by %c15_i32_13 dim 1 : vector<2x256xf32>, i32 -> vector<2x256xf32>
    %57 = vector.extract_strided_slice %6 {offsets = [2, 0], sizes = [1, 256], strides = [1, 1]} : vector<9x256xf32> to vector<1x256xf32>
    %58 = vector.broadcast %57 : vector<1x256xf32> to vector<2x256xf32>
    %59 = arith.mulf %56, %58 : vector<2x256xf32>
    %c1_i32_14 = arith.constant 1 : i32
    %60 = tpu.dynamic_rotate %47 by %c1_i32_14 dim 1 : vector<2x256xf32>, i32 -> vector<2x256xf32>
    %61 = vector.extract_strided_slice %6 {offsets = [3, 0], sizes = [1, 256], strides = [1, 1]} : vector<9x256xf32> to vector<1x256xf32>
    %62 = vector.broadcast %61 : vector<1x256xf32> to vector<2x256xf32>
    %63 = arith.mulf %60, %62 : vector<2x256xf32>
    %c255_i32_15 = arith.constant 255 : i32
    %64 = tpu.dynamic_rotate %47 by %c255_i32_15 dim 1 : vector<2x256xf32>, i32 -> vector<2x256xf32>
    %65 = vector.extract_strided_slice %6 {offsets = [5, 0], sizes = [1, 256], strides = [1, 1]} : vector<9x256xf32> to vector<1x256xf32>
    %66 = vector.broadcast %65 : vector<1x256xf32> to vector<2x256xf32>
    %67 = arith.mulf %64, %66 : vector<2x256xf32>
    %c241_i32_16 = arith.constant 241 : i32
    %68 = tpu.dynamic_rotate %47 by %c241_i32_16 dim 1 : vector<2x256xf32>, i32 -> vector<2x256xf32>
    %69 = vector.extract_strided_slice %6 {offsets = [6, 0], sizes = [1, 256], strides = [1, 1]} : vector<9x256xf32> to vector<1x256xf32>
    %70 = vector.broadcast %69 : vector<1x256xf32> to vector<2x256xf32>
    %71 = arith.mulf %68, %70 : vector<2x256xf32>
    %c240_i32_17 = arith.constant 240 : i32
    %72 = tpu.dynamic_rotate %47 by %c240_i32_17 dim 1 : vector<2x256xf32>, i32 -> vector<2x256xf32>
    %73 = vector.extract_strided_slice %6 {offsets = [7, 0], sizes = [1, 256], strides = [1, 1]} : vector<9x256xf32> to vector<1x256xf32>
    %74 = vector.broadcast %73 : vector<1x256xf32> to vector<2x256xf32>
    %75 = arith.mulf %72, %74 : vector<2x256xf32>
    %c239_i32_18 = arith.constant 239 : i32
    %76 = tpu.dynamic_rotate %47 by %c239_i32_18 dim 1 : vector<2x256xf32>, i32 -> vector<2x256xf32>
    %77 = vector.extract_strided_slice %6 {offsets = [8, 0], sizes = [1, 256], strides = [1, 1]} : vector<9x256xf32> to vector<1x256xf32>
    %78 = vector.broadcast %77 : vector<1x256xf32> to vector<2x256xf32>
    %79 = arith.mulf %76, %78 : vector<2x256xf32>
    %80 = tpu.concatenate %51, %55, %59, %63, %47, %67, %71, %75, %79 in 0 : vector<2x256xf32>, vector<2x256xf32>, vector<2x256xf32>, vector<2x256xf32>, vector<2x256xf32>, vector<2x256xf32>, vector<2x256xf32>, vector<2x256xf32>, vector<2x256xf32> -> vector<18x256xf32>
    %c0_19 = arith.constant 0 : index
    %c0_20 = arith.constant 0 : index
    %81 = vector.load %arg7[%c0_19, %c0_20] : memref<8x18xf32, #tpu.memory_space<vmem>>, vector<8x18xf32>
    %cst_21 = arith.constant dense<0.000000e+00> : vector<8x256xf32>
    %82 = tpu.matmul %81, %80, %cst_21 {dimension_numbers = #tpu.dot_dimension_numbers<[1], [0], [0], [1], [0, 0, 1, 1], [], []>} : vector<8x18xf32>, vector<18x256xf32>, vector<8x256xf32> -> vector<8x256xf32>
    %c0_22 = arith.constant 0 : index
    %c0_23 = arith.constant 0 : index
    %83 = vector.load %arg8[%c0_22, %c0_23] : memref<8x1xf32, #tpu.memory_space<vmem>>, vector<8x1xf32>
    %84 = vector.broadcast %83 : vector<8x1xf32> to vector<8x256xf32>
    %85 = arith.addf %82, %84 : vector<8x256xf32>
    %cst_24 = arith.constant 0.000000e+00 : f32
    %86 = vector.broadcast %cst_24 : f32 to vector<8x256xf32>
    %87 = arith.maximumf %85, %86 : vector<8x256xf32>
    %c0_25 = arith.constant 0 : index
    %c0_26 = arith.constant 0 : index
    %88 = vector.load %arg9[%c0_25, %c0_26] : memref<8x8xf32, #tpu.memory_space<vmem>>, vector<8x8xf32>
    %89 = arith.addf %87, %45 : vector<8x256xf32>
    %cst_27 = arith.constant dense<0.000000e+00> : vector<8x256xf32>
    %90 = tpu.matmul %88, %89, %cst_27 {dimension_numbers = #tpu.dot_dimension_numbers<[1], [0], [0], [1], [0, 0, 1, 1], [], []>} : vector<8x8xf32>, vector<8x256xf32>, vector<8x256xf32> -> vector<8x256xf32>
    %c0_28 = arith.constant 0 : index
    %c0_29 = arith.constant 0 : index
    %91 = vector.load %arg10[%c0_28, %c0_29] : memref<8x1xf32, #tpu.memory_space<vmem>>, vector<8x1xf32>
    %92 = vector.broadcast %91 : vector<8x1xf32> to vector<8x256xf32>
    %93 = arith.addf %90, %92 : vector<8x256xf32>
    %cst_30 = arith.constant 0.000000e+00 : f32
    %94 = vector.broadcast %cst_30 : f32 to vector<8x256xf32>
    %95 = arith.maximumf %93, %94 : vector<8x256xf32>
    %c0_31 = arith.constant 0 : index
    %c32 = arith.constant 32 : index
    %96 = vector.load %arg11[%c0_31, %c32] : memref<10x72xf32, #tpu.memory_space<vmem>>, vector<10x8xf32>
    %cst_32 = arith.constant dense<0.000000e+00> : vector<10x256xf32>
    %97 = tpu.matmul %96, %95, %cst_32 {dimension_numbers = #tpu.dot_dimension_numbers<[1], [0], [0], [1], [0, 0, 1, 1], [], []>} : vector<10x8xf32>, vector<8x256xf32>, vector<10x256xf32> -> vector<10x256xf32>
    %c0_33 = arith.constant 0 : index
    %c0_34 = arith.constant 0 : index
    %98 = vector.load %arg11[%c0_33, %c0_34] : memref<10x72xf32, #tpu.memory_space<vmem>>, vector<10x8xf32>
    %c17_i32_35 = arith.constant 17 : i32
    %99 = tpu.dynamic_rotate %95 by %c17_i32_35 dim 1 : vector<8x256xf32>, i32 -> vector<8x256xf32>
    %100 = vector.extract_strided_slice %6 {offsets = [0, 0], sizes = [1, 256], strides = [1, 1]} : vector<9x256xf32> to vector<1x256xf32>
    %101 = vector.broadcast %100 : vector<1x256xf32> to vector<8x256xf32>
    %102 = arith.mulf %99, %101 : vector<8x256xf32>
    %cst_36 = arith.constant dense<0.000000e+00> : vector<10x256xf32>
    %103 = tpu.matmul %98, %102, %cst_36 {dimension_numbers = #tpu.dot_dimension_numbers<[1], [0], [0], [1], [0, 0, 1, 1], [], []>} : vector<10x8xf32>, vector<8x256xf32>, vector<10x256xf32> -> vector<10x256xf32>
    %104 = arith.addf %97, %103 : vector<10x256xf32>
    %c0_37 = arith.constant 0 : index
    %c8 = arith.constant 8 : index
    %105 = vector.load %arg11[%c0_37, %c8] : memref<10x72xf32, #tpu.memory_space<vmem>>, vector<10x8xf32>
    %c16_i32_38 = arith.constant 16 : i32
    %106 = tpu.dynamic_rotate %95 by %c16_i32_38 dim 1 : vector<8x256xf32>, i32 -> vector<8x256xf32>
    %107 = vector.extract_strided_slice %6 {offsets = [1, 0], sizes = [1, 256], strides = [1, 1]} : vector<9x256xf32> to vector<1x256xf32>
    %108 = vector.broadcast %107 : vector<1x256xf32> to vector<8x256xf32>
    %109 = arith.mulf %106, %108 : vector<8x256xf32>
    %cst_39 = arith.constant dense<0.000000e+00> : vector<10x256xf32>
    %110 = tpu.matmul %105, %109, %cst_39 {dimension_numbers = #tpu.dot_dimension_numbers<[1], [0], [0], [1], [0, 0, 1, 1], [], []>} : vector<10x8xf32>, vector<8x256xf32>, vector<10x256xf32> -> vector<10x256xf32>
    %111 = arith.addf %104, %110 : vector<10x256xf32>
    %c0_40 = arith.constant 0 : index
    %c16 = arith.constant 16 : index
    %112 = vector.load %arg11[%c0_40, %c16] : memref<10x72xf32, #tpu.memory_space<vmem>>, vector<10x8xf32>
    %c15_i32_41 = arith.constant 15 : i32
    %113 = tpu.dynamic_rotate %95 by %c15_i32_41 dim 1 : vector<8x256xf32>, i32 -> vector<8x256xf32>
    %114 = vector.extract_strided_slice %6 {offsets = [2, 0], sizes = [1, 256], strides = [1, 1]} : vector<9x256xf32> to vector<1x256xf32>
    %115 = vector.broadcast %114 : vector<1x256xf32> to vector<8x256xf32>
    %116 = arith.mulf %113, %115 : vector<8x256xf32>
    %cst_42 = arith.constant dense<0.000000e+00> : vector<10x256xf32>
    %117 = tpu.matmul %112, %116, %cst_42 {dimension_numbers = #tpu.dot_dimension_numbers<[1], [0], [0], [1], [0, 0, 1, 1], [], []>} : vector<10x8xf32>, vector<8x256xf32>, vector<10x256xf32> -> vector<10x256xf32>
    %118 = arith.addf %111, %117 : vector<10x256xf32>
    %c0_43 = arith.constant 0 : index
    %c24 = arith.constant 24 : index
    %119 = vector.load %arg11[%c0_43, %c24] : memref<10x72xf32, #tpu.memory_space<vmem>>, vector<10x8xf32>
    %c1_i32_44 = arith.constant 1 : i32
    %120 = tpu.dynamic_rotate %95 by %c1_i32_44 dim 1 : vector<8x256xf32>, i32 -> vector<8x256xf32>
    %121 = vector.extract_strided_slice %6 {offsets = [3, 0], sizes = [1, 256], strides = [1, 1]} : vector<9x256xf32> to vector<1x256xf32>
    %122 = vector.broadcast %121 : vector<1x256xf32> to vector<8x256xf32>
    %123 = arith.mulf %120, %122 : vector<8x256xf32>
    %cst_45 = arith.constant dense<0.000000e+00> : vector<10x256xf32>
    %124 = tpu.matmul %119, %123, %cst_45 {dimension_numbers = #tpu.dot_dimension_numbers<[1], [0], [0], [1], [0, 0, 1, 1], [], []>} : vector<10x8xf32>, vector<8x256xf32>, vector<10x256xf32> -> vector<10x256xf32>
    %125 = arith.addf %118, %124 : vector<10x256xf32>
    %c0_46 = arith.constant 0 : index
    %c40 = arith.constant 40 : index
    %126 = vector.load %arg11[%c0_46, %c40] : memref<10x72xf32, #tpu.memory_space<vmem>>, vector<10x8xf32>
    %c255_i32_47 = arith.constant 255 : i32
    %127 = tpu.dynamic_rotate %95 by %c255_i32_47 dim 1 : vector<8x256xf32>, i32 -> vector<8x256xf32>
    %128 = vector.extract_strided_slice %6 {offsets = [5, 0], sizes = [1, 256], strides = [1, 1]} : vector<9x256xf32> to vector<1x256xf32>
    %129 = vector.broadcast %128 : vector<1x256xf32> to vector<8x256xf32>
    %130 = arith.mulf %127, %129 : vector<8x256xf32>
    %cst_48 = arith.constant dense<0.000000e+00> : vector<10x256xf32>
    %131 = tpu.matmul %126, %130, %cst_48 {dimension_numbers = #tpu.dot_dimension_numbers<[1], [0], [0], [1], [0, 0, 1, 1], [], []>} : vector<10x8xf32>, vector<8x256xf32>, vector<10x256xf32> -> vector<10x256xf32>
    %132 = arith.addf %125, %131 : vector<10x256xf32>
    %c0_49 = arith.constant 0 : index
    %c48 = arith.constant 48 : index
    %133 = vector.load %arg11[%c0_49, %c48] : memref<10x72xf32, #tpu.memory_space<vmem>>, vector<10x8xf32>
    %c241_i32_50 = arith.constant 241 : i32
    %134 = tpu.dynamic_rotate %95 by %c241_i32_50 dim 1 : vector<8x256xf32>, i32 -> vector<8x256xf32>
    %135 = vector.extract_strided_slice %6 {offsets = [6, 0], sizes = [1, 256], strides = [1, 1]} : vector<9x256xf32> to vector<1x256xf32>
    %136 = vector.broadcast %135 : vector<1x256xf32> to vector<8x256xf32>
    %137 = arith.mulf %134, %136 : vector<8x256xf32>
    %cst_51 = arith.constant dense<0.000000e+00> : vector<10x256xf32>
    %138 = tpu.matmul %133, %137, %cst_51 {dimension_numbers = #tpu.dot_dimension_numbers<[1], [0], [0], [1], [0, 0, 1, 1], [], []>} : vector<10x8xf32>, vector<8x256xf32>, vector<10x256xf32> -> vector<10x256xf32>
    %139 = arith.addf %132, %138 : vector<10x256xf32>
    %c0_52 = arith.constant 0 : index
    %c56 = arith.constant 56 : index
    %140 = vector.load %arg11[%c0_52, %c56] : memref<10x72xf32, #tpu.memory_space<vmem>>, vector<10x8xf32>
    %c240_i32_53 = arith.constant 240 : i32
    %141 = tpu.dynamic_rotate %95 by %c240_i32_53 dim 1 : vector<8x256xf32>, i32 -> vector<8x256xf32>
    %142 = vector.extract_strided_slice %6 {offsets = [7, 0], sizes = [1, 256], strides = [1, 1]} : vector<9x256xf32> to vector<1x256xf32>
    %143 = vector.broadcast %142 : vector<1x256xf32> to vector<8x256xf32>
    %144 = arith.mulf %141, %143 : vector<8x256xf32>
    %cst_54 = arith.constant dense<0.000000e+00> : vector<10x256xf32>
    %145 = tpu.matmul %140, %144, %cst_54 {dimension_numbers = #tpu.dot_dimension_numbers<[1], [0], [0], [1], [0, 0, 1, 1], [], []>} : vector<10x8xf32>, vector<8x256xf32>, vector<10x256xf32> -> vector<10x256xf32>
    %146 = arith.addf %139, %145 : vector<10x256xf32>
    %c0_55 = arith.constant 0 : index
    %c64 = arith.constant 64 : index
    %147 = vector.load %arg11[%c0_55, %c64] : memref<10x72xf32, #tpu.memory_space<vmem>>, vector<10x8xf32>
    %c239_i32_56 = arith.constant 239 : i32
    %148 = tpu.dynamic_rotate %95 by %c239_i32_56 dim 1 : vector<8x256xf32>, i32 -> vector<8x256xf32>
    %149 = vector.extract_strided_slice %6 {offsets = [8, 0], sizes = [1, 256], strides = [1, 1]} : vector<9x256xf32> to vector<1x256xf32>
    %150 = vector.broadcast %149 : vector<1x256xf32> to vector<8x256xf32>
    %151 = arith.mulf %148, %150 : vector<8x256xf32>
    %cst_57 = arith.constant dense<0.000000e+00> : vector<10x256xf32>
    %152 = tpu.matmul %147, %151, %cst_57 {dimension_numbers = #tpu.dot_dimension_numbers<[1], [0], [0], [1], [0, 0, 1, 1], [], []>} : vector<10x8xf32>, vector<8x256xf32>, vector<10x256xf32> -> vector<10x256xf32>
    %153 = arith.addf %146, %152 : vector<10x256xf32>
    %c0_58 = arith.constant 0 : index
    %c0_59 = arith.constant 0 : index
    %154 = vector.load %arg12[%c0_58, %c0_59] : memref<10x1xf32, #tpu.memory_space<vmem>>, vector<10x1xf32>
    %155 = vector.broadcast %154 : vector<10x1xf32> to vector<10x256xf32>
    %156 = arith.addf %153, %155 : vector<10x256xf32>
    %c0_60 = arith.constant 0 : index
    %c0_61 = arith.constant 0 : index
    %157 = vector.load %arg13[%c0_60, %c0_61] : memref<2x1xf32, #tpu.memory_space<vmem>>, vector<2x1xf32>
    %158 = vector.extract_strided_slice %156 {offsets = [0, 0], sizes = [2, 256], strides = [1, 1]} : vector<10x256xf32> to vector<2x256xf32>
    %159 = math.tanh %158 : vector<2x256xf32>
    %160 = vector.broadcast %157 : vector<2x1xf32> to vector<2x256xf32>
    %161 = arith.mulf %160, %159 : vector<2x256xf32>
    %162 = vector.extract_strided_slice %156 {offsets = [8, 0], sizes = [2, 256], strides = [1, 1]} : vector<10x256xf32> to vector<2x256xf32>
    %163 = math.exp %161 : vector<2x256xf32>
    %164 = arith.mulf %163, %3 : vector<2x256xf32>
    %165 = arith.addf %164, %162 : vector<2x256xf32>
    %166 = tpu.concatenate %2, %165 in 0 : vector<2x256xf32>, vector<2x256xf32> -> vector<4x256xf32>
    %c0_62 = arith.constant 0 : index
    %c0_63 = arith.constant 0 : index
    %c0_64 = arith.constant 0 : index
    %167 = vector.load %arg14[%c0_62, %c0_63, %c0_64] : memref<1x4x256xf32, #tpu.memory_space<vmem>>, vector<1x4x256xf32>
    %168 = vector.shape_cast %167 : vector<1x4x256xf32> to vector<4x256xf32>
    %169 = vector.shape_cast %166 : vector<4x256xf32> to vector<1x4x256xf32>
    tpu.vector_store %arg14[%c0_62, %c0_63, %c0_64], %169 {strides = array<i32>} : memref<1x4x256xf32, #tpu.memory_space<vmem>>, vector<1x4x256xf32>,
    %cst_65 = arith.constant dense<0.000000e+00> : vector<2xf32>
    %170 = vector.multi_reduction <add>, %161, %cst_65 [1] : vector<2x256xf32> to vector<2xf32>
    %171 = vector.shape_cast %170 : vector<2xf32> to vector<2x1xf32>
    %cst_66 = arith.constant dense<0.000000e+00> : vector<1xf32>
    %172 = vector.multi_reduction <add>, %171, %cst_66 [0] : vector<2x1xf32> to vector<1xf32>
    %173 = vector.shape_cast %172 : vector<1xf32> to vector<1x1xf32>
    %c0_67 = arith.constant 0 : index
    %c0_68 = arith.constant 0 : index
    %c0_69 = arith.constant 0 : index
    %174 = vector.load %arg3[%c0_67, %c0_68, %c0_69] : memref<1x1x1xf32, #tpu.memory_space<vmem>>, vector<1x1x1xf32>
    %175 = vector.shape_cast %174 : vector<1x1x1xf32> to vector<1x1xf32>
    %176 = arith.addf %175, %173 : vector<1x1xf32>
    %c0_70 = arith.constant 0 : index
    %c0_71 = arith.constant 0 : index
    %c0_72 = arith.constant 0 : index
    %177 = vector.load %arg15[%c0_70, %c0_71, %c0_72] : memref<1x1x1xf32, #tpu.memory_space<vmem>>, vector<1x1x1xf32>
    %178 = vector.shape_cast %177 : vector<1x1x1xf32> to vector<1x1xf32>
    %179 = vector.shape_cast %176 : vector<1x1xf32> to vector<1x1x1xf32>
    tpu.vector_store %arg15[%c0_70, %c0_71, %c0_72], %179 {strides = array<i32>} : memref<1x1x1xf32, #tpu.memory_space<vmem>>, vector<1x1x1xf32>,
    return
  }
  func.func @transform_0(%arg0: i32) -> (i32, i32, i32) {
    %c0_i32 = arith.constant 0 : i32
    %c0_i32_0 = arith.constant 0 : i32
    %c0_i32_1 = arith.constant 0 : i32
    return %arg0, %c0_i32, %c0_i32_0 : i32, i32, i32
  }
  func.func @transform_1(%arg0: i32) -> (i32, i32, i32) {
    %c0_i32 = arith.constant 0 : i32
    %c0_i32_0 = arith.constant 0 : i32
    %c0_i32_1 = arith.constant 0 : i32
    return %arg0, %c0_i32, %c0_i32_0 : i32, i32, i32
  }
  func.func @transform_2(%arg0: i32) -> (i32, i32, i32) {
    %c0_i32 = arith.constant 0 : i32
    %c0_i32_0 = arith.constant 0 : i32
    %c0_i32_1 = arith.constant 0 : i32
    return %arg0, %c0_i32, %c0_i32_0 : i32, i32, i32
  }
  func.func @transform_3(%arg0: i32) -> (i32, i32) {
    %c0_i32 = arith.constant 0 : i32
    %c0_i32_0 = arith.constant 0 : i32
    %c0_i32_1 = arith.constant 0 : i32
    return %c0_i32, %c0_i32_0 : i32, i32
  }
  func.func @transform_4(%arg0: i32) -> (i32, i32) {
    %c0_i32 = arith.constant 0 : i32
    %c0_i32_0 = arith.constant 0 : i32
    %c0_i32_1 = arith.constant 0 : i32
    return %c0_i32, %c0_i32_0 : i32, i32
  }
  func.func @transform_5(%arg0: i32) -> (i32, i32) {
    %c0_i32 = arith.constant 0 : i32
    %c0_i32_0 = arith.constant 0 : i32
    %c0_i32_1 = arith.constant 0 : i32
    return %c0_i32, %c0_i32_0 : i32, i32
  }
  func.func @transform_6(%arg0: i32) -> (i32, i32) {
    %c0_i32 = arith.constant 0 : i32
    %c0_i32_0 = arith.constant 0 : i32
    %c0_i32_1 = arith.constant 0 : i32
    return %c0_i32, %c0_i32_0 : i32, i32
  }
  func.func @transform_7(%arg0: i32) -> (i32, i32) {
    %c0_i32 = arith.constant 0 : i32
    %c0_i32_0 = arith.constant 0 : i32
    %c0_i32_1 = arith.constant 0 : i32
    return %c0_i32, %c0_i32_0 : i32, i32
  }
  func.func @transform_8(%arg0: i32) -> (i32, i32) {
    %c0_i32 = arith.constant 0 : i32
    %c0_i32_0 = arith.constant 0 : i32
    %c0_i32_1 = arith.constant 0 : i32
    return %c0_i32, %c0_i32_0 : i32, i32
  }
  func.func @transform_9(%arg0: i32) -> (i32, i32) {
    %c0_i32 = arith.constant 0 : i32
    %c0_i32_0 = arith.constant 0 : i32
    %c0_i32_1 = arith.constant 0 : i32
    return %c0_i32, %c0_i32_0 : i32, i32
  }
  func.func @transform_10(%arg0: i32) -> (i32, i32) {
    %c0_i32 = arith.constant 0 : i32
    %c0_i32_0 = arith.constant 0 : i32
    %c0_i32_1 = arith.constant 0 : i32
    return %c0_i32, %c0_i32_0 : i32, i32
  }
  func.func @transform_11(%arg0: i32) -> (i32, i32) {
    %c0_i32 = arith.constant 0 : i32
    %c0_i32_0 = arith.constant 0 : i32
    %c0_i32_1 = arith.constant 0 : i32
    return %c0_i32, %c0_i32_0 : i32, i32
  }
  func.func @transform_12(%arg0: i32) -> (i32, i32) {
    %c0_i32 = arith.constant 0 : i32
    %c0_i32_0 = arith.constant 0 : i32
    %c0_i32_1 = arith.constant 0 : i32
    return %c0_i32, %c0_i32_0 : i32, i32
  }
  func.func @transform_13(%arg0: i32) -> (i32, i32, i32) {
    %c0_i32 = arith.constant 0 : i32
    %c0_i32_0 = arith.constant 0 : i32
    %c0_i32_1 = arith.constant 0 : i32
    return %arg0, %c0_i32, %c0_i32_0 : i32, i32, i32
  }
  func.func @transform_14(%arg0: i32) -> (i32, i32, i32) {
    %c0_i32 = arith.constant 0 : i32
    %c0_i32_0 = arith.constant 0 : i32
    %c0_i32_1 = arith.constant 0 : i32
    return %arg0, %c0_i32, %c0_i32_0 : i32, i32, i32
  }
}

</mosaic_0001>

<bundles_post_ra>
// kernel: coupling_forward.1
= control target key start
LH: loop header
LB: loop body
LE: loop exit
PB: predicated region body
PF: predicated region fallthrough
CT: control target
= control target key end

     0   :  { %s2018_s29 = smov 0   ;;  %s2497_s0 = inlined_call_operand.vmem [shape: f32[2,4,256], index: 0, kind: input, shape index: {}]   ;;  %s2498_s1 = inlined_call_operand.vmem [shape: f32[2,3,256], index: 1, kind: input, shape index: {}]   ;;  %s2499_s2 = inlined_call_operand.vmem [shape: f32[2,1,1], index: 2, kind: input, shape index: {}]   ;;  %s2500_s3 = inlined_call_operand.vmem [shape: f32[9,256], index: 3, kind: input, shape index: {}]   ;;  %s2501_s4 = inlined_call_operand.vmem [shape: f32[10,27], index: 4, kind: input, shape index: {}]   ;;  %s2502_s5 = inlined_call_operand.vmem [shape: f32[10,1], index: 5, kind: input, shape index: {}]   ;;  %s2503_s6 = inlined_call_operand.vmem [shape: f32[8,18], index: 6, kind: input, shape index: {}]   ;;  %s2504_s7 = inlined_call_operand.vmem [shape: f32[8,1], index: 7, kind: input, shape index: {}]   ;;  %s2505_s8 = inlined_call_operand.vmem [shape: f32[8,8], index: 8, kind: input, shape index: {}]   ;;  %s2506_s9 = inlined_call_operand.vmem [shape: f32[8,1], index: 9, kind: input, shape index: {}]   ;;  %s2507_s10 = inlined_call_operand.vmem [shape: f32[10,72], index: 10, kind: input, shape index: {}]   ;;  %s2508_s11 = inlined_call_operand.vmem [shape: f32[10,1], index: 11, kind: input, shape index: {}]   ;;  %s2509_s12 = inlined_call_operand.vmem [shape: f32[2,1], index: 12, kind: input, shape index: {}]   ;;  %s2510_s13 = inlined_call_operand.vmem [shape: f32[2,4,256], index: 13, kind: output, shape index: {0}]   ;;  %s2511_s14 = inlined_call_operand.vmem [shape: f32[2,1,1], index: 14, kind: output, shape index: {1}]  }
   0x1 LB: > { %s1818_s30 = sadd.s32 4294967295, %s1925_s29   ;;  %p1822_p0 = scmp.ge.s32.totalorder %s1925_s29, 1  ;;  %s1925_s29 = sphi %s2018_s29, %s25_s29  }
   0x2   : > { %p433_p1 = scmp.lt.s32.totalorder %s1925_s29, 3 }
   0x4   : > { %p434_p2 = pnand %p1822_p0, %p433_p1 }
   0x5   : > { %p490_p3 = scmp.lt.s32.totalorder (!%p434_p2), %s1818_s30, 1  ;;  %s1927_s19 = smov (!%p434_p2), 16  }
   0x6   : > { %437 = sbr.rel (%p434_p2) target bundleno = 1284 (0x504), region = 72  ;;  %s1928_s20 = smov (!%p434_p2), 15  }
   0x7   : > { %s1929_s21 = smov (!%p434_p2), 1   ;;  %s1930_s22 = smov (!%p434_p2), 127  }
   0x8   : > { %s1931_s23 = smov (!%p434_p2), 113   ;;  %s1932_s24 = smov (!%p434_p2), 112  }
   0x9   : > { %s2512_s25 = smov (!%p434_p2), 111   ;;  %s1934_s26 = smov (!%p434_p2), 17  }
   0xa   : > { %s1937_s27 = smov (!%p434_p2), 120   ;;  %s1942_s16 = smov (!%p434_p2), 64  }
   0xb   : > { %s2516_s30 = smov (!%p490_p3, %s1818_s30), 1  ;;  %v527_v22 = vlaneseq  ;;  %v2058_v25 = vld [vmem:[%s2500_s3] sm:$0xff]  ;;  %v2063_v26 = vld [vmem:[%s2500_s3 + $0x8] sm:$0xff]  ;;  %v1935_v63 = vmov 0   ;;  %vm705_vm6 = vcmask 1041408   ;;  %vm696_vm7 = vcmask 1040384  }
   0xc   : > { %s2029_s15 = sshll.u32 %s2516_s30, 3  ;;  %v2067_v30 = vperm.slane %v2058_v25, 2  ;;  %v2070_v31 = vperm.slane %v2063_v26, 2  ;;  %v2078_v34 = vperm.slane %v2058_v25, 3  ;;  %v2081_v35 = vperm.slane %v2063_v26, 3  ;;  %1906 = vset.pattern.permute.xlu1 %v1935_v63  ;;  %1907 = vset.pattern.permute.xlu0 %v1935_v63 }
   0xd   : > { %s499_s18 = scalar_lea.vmem %s2498_s1, %s2029_s15  ;;  %v2053_v24 = vand.u32 127, %v527_v22  ;;  %v2085_v36 = vperm.slane %v2058_v25, 5  ;;  %v2089_v37 = vperm.slane %v2058_v25, 6  ;;  %v2092_v38 = vperm.slane %v2063_v26, 6  ;;  %v714_v56 = vld [vmem:[%s2502_s5 + $0x8] sm:$0x3]  ;;  %1908 = vset.pattern.permute.xlu2 %v1935_v63  ;;  %s494_s28 = scalar_lea.vmem %s2497_s0, %s2029_s15 }
   0xe   : > { %v512_v0 = vld [vmem:[%s499_s18] sm:$0x77]  ;;  %v2101_v41 = vperm.slane %v2063_v26, 5  ;;  %v2109_v45 = vperm.slane %v2058_v25, 7  ;;  %v2112_v46 = vperm.slane %v2063_v26, 7  ;;  %vm690_vm8 = vcmask 1042432  }
   0xf   : > { %518 = vst [vmem:[#allocation1] ss:$2 sm:$0xff] %v512_v0  ;;  %vm561_vm0 = vcmp.lt.s32.totalorder %v2053_v24, 15  ;;  %vm577_vm1 = vcmp.lt.s32.totalorder %v2053_v24, 1  ;;  %vm593_vm2 = vcmp.lt.s32.totalorder %v2053_v24, 127  ;;  %vm609_vm3 = vcmp.lt.s32.totalorder %v2053_v24, 113 }
  0x10   : > { %vm625_vm4 = vcmp.lt.s32.totalorder %v2053_v24, 112  ;;  %vm641_vm5 = vcmp.lt.s32.totalorder %v2053_v24, 111  ;;  %vm708_vm9 = vcmask 1044480   ;;  %vm699_vm10 = vcmask 1043456  }
  0x11   : > { %vm545_vm11 = vcmp.lt.s32.totalorder %v2053_v24, 16  ;;  %vm702_vm12 = vcmask 1046528   ;;  %vm529_vm13 = vcmp.lt.s32.totalorder %v2053_v24, 17  ;;  %vm693_vm14 = vcmask 1045504  }
  0x12   : > { %vm725_vm15 = vcmask 220160  }
  0x16   : > { %v519_v1 = vld.sshfl [vmem:[#allocation1] sm:$0xff pattern:$0x75316420]  ;;  %v520_v2 = vld.sshfl [vmem:[#allocation1 + $0x8] sm:$0xff pattern:$0x75316420] }
  0x17   : > { %536 = vst [vmem:[#allocation1] ss:$2 sm:$0xff] %v512_v0 }
  0x1e   : > { %v537_v3 = vld.sshfl [vmem:[#allocation1] sm:$0xff pattern:$0x75316420]  ;;  %v538_v4 = vld.sshfl [vmem:[#allocation1 + $0x8] sm:$0xff pattern:$0x75316420] }
  0x1f   : > { %541 = vrot.lane.b32.xlu0 %v537_v3, %s1927_s19  ;;  %552 = vst [vmem:[#allocation1] ss:$2 sm:$0xff] %v512_v0 }
  0x26   : > { %v553_v5 = vld.sshfl [vmem:[#allocation1] sm:$0xff pattern:$0x75316420]  ;;  %v554_v6 = vld.sshfl [vmem:[#allocation1 + $0x8] sm:$0xff pattern:$0x75316420] }
  0x27   : > { %568 = vst [vmem:[#allocation1] ss:$2 sm:$0xff] %v512_v0  ;;  %557 = vrot.lane.b32.xlu2 %v553_v5, %s1928_s20  ;;  %v2143_v5 = vld [vmem:[%s2500_s3 + $0x10] ss:$0 sm:$0xff] }
  0x2e   : > { %v569_v7 = vld.sshfl [vmem:[#allocation1] sm:$0xff pattern:$0x75316420]  ;;  %v570_v8 = vld.sshfl [vmem:[#allocation1 + $0x8] sm:$0xff pattern:$0x75316420] }
  0x2f   : > { %573 = vrot.lane.b32.xlu0 %v569_v7, %s1929_s21  ;;  %575 = vrot.lane.b32.xlu1 %v570_v8, %s1929_s21  ;;  %584 = vst [vmem:[#allocation1] ss:$2 sm:$0xff] %v512_v0 }
  0x30   : > { %559 = vrot.lane.b32.xlu2 %v554_v6, %s1928_s20  ;;  %v2148_v6 = vld [vmem:[%s2500_s3 + $0x18] ss:$0 sm:$0xff] }
  0x36   : > { %v585_v9 = vld.sshfl [vmem:[#allocation1] sm:$0xff pattern:$0x75316420]  ;;  %v586_v10 = vld.sshfl [vmem:[#allocation1 + $0x8] sm:$0xff pattern:$0x75316420] }
  0x37   : > { %589 = vrot.lane.b32.xlu0 %v585_v9, %s1930_s22  ;;  %600 = vst [vmem:[#allocation1] ss:$2 sm:$0xff] %v512_v0 }
  0x3e   : > { %v601_v11 = vld.sshfl [vmem:[#allocation1] sm:$0xff pattern:$0x75316420]  ;;  %v602_v12 = vld.sshfl [vmem:[#allocation1 + $0x8] sm:$0xff pattern:$0x75316420] }
  0x3f   : > { %591 = vrot.lane.b32.xlu0 %v586_v10, %s1930_s22  ;;  %605 = vrot.lane.b32.xlu1 %v601_v11, %s1931_s23  ;;  %616 = vst [vmem:[#allocation1] ss:$2 sm:$0xff] %v512_v0 }
  0x46   : > { %v618_v13 = vld.sshfl [vmem:[#allocation1 + $0x8] sm:$0xff pattern:$0x75316420]  ;;  %v617_v14 = vld.sshfl [vmem:[#allocation1] sm:$0xff pattern:$0x75316420] }
  0x47   : > { %607 = vrot.lane.b32.xlu1 %v602_v12, %s1931_s23  ;;  %623 = vrot.lane.b32.xlu0 %v618_v13, %s1932_s24  ;;  %632 = vst [vmem:[#allocation1] ss:$2 sm:$0xff] %v512_v0 }
  0x48   : > { %621 = vrot.lane.b32.xlu2 %v617_v14, %s1932_s24 }
  0x4e   : > { %v633_v15 = vld.sshfl [vmem:[#allocation1] sm:$0xff pattern:$0x75316420]  ;;  %v634_v16 = vld.sshfl [vmem:[#allocation1 + $0x8] sm:$0xff pattern:$0x75316420] }
  0x4f   : > { %637 = vrot.lane.b32.xlu1 %v633_v15, %s2512_s25  ;;  %525 = vrot.lane.b32.xlu0 %v520_v2, %s1934_s26  ;;  %667 = vst [vmem:[#allocation1 + $0x1] ss:$2 sm:$0xff] %v512_v0 }
  0x50   : > { %639 = vrot.lane.b32.xlu2 %v634_v16, %s2512_s25 }
  0x57   : > { %543 = vrot.lane.b32.xlu1 %v538_v4, %s1927_s19 }
  0x58   : > { %523 = vrot.lane.b32.xlu2 %v519_v1, %s1934_s26 }
  0x5f   : > { %722 = vperm.xlu1 %1906, %v714_v56  }
  0x81   : > { %v558_v18 = vpop.permute.xlu2 %557 }
  0x8a   : > { %v560_v23 = vpop.permute.xlu2 %559 }
  0x8b   : > { %v562_v32 = vsel %vm561_vm0, %v558_v18, %v560_v23  ;;  %v563_v33 = vsel %vm561_vm0, %v560_v23, %v558_v18  ;;  %v669_v23 = vld.sshfl [vmem:[#allocation1 + $0x8] sm:$0xff pattern:$0x75316420] }
  0x8c   : > { %v2095_v39 = vmul.f32 %v2067_v30, %v563_v33  ;;  %v2098_v40 = vmul.f32 %v2070_v31, %v562_v32 }
  0x8e   : > { %v656_v59 = vrot.slane %v2095_v39, 2  ;;  %v657_v0 = vrot.slane %v2098_v40, 2 }
  0x91   : > { %v2051_v17 = vpop.permute.xlu0 %541 }
  0xa1   : > { %v574_v19 = vpop.permute.xlu0 %573  ;;  %v576_v20 = vpop.permute.xlu1 %575 }
  0xa2   : > { %v622_v29 = vpop.permute.xlu2 %621  ;;  %v578_v42 = vsel %vm577_vm1, %v574_v19, %v576_v20  ;;  %v579_v43 = vsel %vm577_vm1, %v576_v20, %v574_v19 }
  0xa3   : > { %v582_v57 = vmul.f32 %v2078_v34, %v579_v43  ;;  %v583_v58 = vmul.f32 %v2081_v35, %v578_v42  ;;  %v2171_v42 = vperm.slane %v2058_v25, 1  ;;  %v2174_v43 = vperm.slane %v2063_v26, 1 }
  0xa5   : > { %v662_v7 = vrot.slane %v582_v57, 7  ;;  %v663_v8 = vrot.slane %v583_v58, 7 }
  0xa7   : > { %v697_v22 = vsel %vm696_vm7, %v656_v59, %v662_v7 }
  0xa9   : > { %v590_v21 = vpop.permute.xlu0 %589 }
  0xaa   : > { %v640_v62 = vpop.permute.xlu2 %639 }
  0xb1   : > { %v592_v27 = vpop.permute.xlu0 %591  ;;  %v606_v28 = vpop.permute.xlu1 %605 }
  0xb2   : > { %v594_v48 = vsel %vm593_vm2, %v590_v21, %v592_v27  ;;  %v595_v49 = vsel %vm593_vm2, %v592_v27, %v590_v21  ;;  %v668_v21 = vld.sshfl [vmem:[#allocation1] sm:$0xff pattern:$0x75316420]  ;;  %v698_v27 = vsel %vm696_vm7, %v657_v0, %v663_v8  ;;  %vm955_vm7 = vcmask 146432  }
  0xb3   : > { %v598_v60 = vmul.f32 %v2085_v36, %v594_v48  ;;  %v599_v61 = vmul.f32 %v2101_v41, %v595_v49  ;;  %v2179_v48 = vperm.slane %v2058_v25, 0  ;;  %v2182_v49 = vperm.slane %v2063_v26, 0 }
  0xb5   : > { %v674_v9 = vrot.slane %v598_v60, 1  ;;  %v675_v10 = vrot.slane %v599_v61, 1 }
  0xb9   : > { %v608_v44 = vpop.permute.xlu1 %607  ;;  %v624_v47 = vpop.permute.xlu0 %623 }
  0xba   : > { %v610_v50 = vsel %vm609_vm3, %v606_v28, %v608_v44  ;;  %v611_v51 = vsel %vm609_vm3, %v608_v44, %v606_v28  ;;  %v626_v54 = vsel %vm625_vm4, %v622_v29, %v624_v47  ;;  %v627_v55 = vsel %vm625_vm4, %v624_v47, %v622_v29  ;;  %v524_v29 = vpop.permute.xlu2 %523 }
  0xbb   : > { %v614_v52 = vmul.f32 %v2089_v37, %v610_v50  ;;  %v615_v53 = vmul.f32 %v2092_v38, %v611_v51  ;;  %v630_v1 = vmul.f32 %v2109_v45, %v626_v54  ;;  %v631_v2 = vmul.f32 %v2112_v46, %v627_v55 }
  0xbc   : > { %v700_v44 = vsel %vm699_vm10, %v697_v22, %v668_v21  ;;  %v701_v47 = vsel %vm699_vm10, %v698_v27, %v669_v23 }
  0xbd   : > { %v680_v3 = vrot.slane %v614_v52, 6  ;;  %v681_v4 = vrot.slane %v615_v53, 6  ;;  %v686_v12 = vrot.slane %v630_v1, 3  ;;  %v687_v13 = vrot.slane %v631_v2, 3 }
  0xbe   : > { %v703_v50 = vsel %vm702_vm12, %v700_v44, %v674_v9  ;;  %v704_v51 = vsel %vm702_vm12, %v701_v47, %v675_v10 }
  0xbf   : > { %v706_v19 = vsel %vm705_vm6, %v674_v9, %v680_v3  ;;  %v707_v20 = vsel %vm705_vm6, %v675_v10, %v681_v4  ;;  %v712_v3 = vld [vmem:[%s2501_s4 + $0x8] sm:$0x3]  ;;  %v2220_v9 = vld [vmem:[%s494_s28] sm:$0xff]  ;;  %s1936_s28 = smov 96  }
  0xc0   : > { %v709_v32 = vsel %vm708_vm9, %v706_v19, %v686_v12  ;;  %v710_v33 = vsel %vm708_vm9, %v707_v20, %v687_v13 }
  0xc1   : > { %v638_v11 = vpop.permute.xlu1 %637  ;;  %v526_v28 = vpop.permute.xlu0 %525 }
  0xc2   : > { %v642_v14 = vsel %vm641_vm5, %v638_v11, %v640_v62  ;;  %v643_v15 = vsel %vm641_vm5, %v640_v62, %v638_v11  ;;  %v530_v52 = vsel %vm529_vm13, %v524_v29, %v526_v28  ;;  %v531_v53 = vsel %vm529_vm13, %v526_v28, %v524_v29 }
  0xc3   : > { %v646_v16 = vmul.f32 %v2143_v5, %v642_v14  ;;  %v647_v18 = vmul.f32 %v2148_v6, %v643_v15  ;;  %v534_v57 = vmul.f32 %v2179_v48, %v531_v53  ;;  %v535_v58 = vmul.f32 %v2182_v49, %v530_v52 }
  0xc5   : > { %1829 = vmatpush.msk.msra.mxu0 %vm690_vm8, %v646_v16  ;;  %1832 = vmatpush.msk.msra.mxu1 %vm690_vm8, %v647_v18 }
  0xc7   : > { %751 = vmatpush.msra.mxu0 %v709_v32  ;;  %774 = vmatpush.msra.mxu1 %v710_v33 }
  0xc9   : > { %v544_v54 = vpop.permute.xlu1 %543  ;;  %752 = vmatpush.msra.mxu0 %v703_v50  ;;  %775 = vmatpush.msra.mxu1 %v704_v51  ;;  %v713_v51 = vld [vmem:[%s2502_s5] sm:$0xff] }
  0xca   : > { %v546_v55 = vsel %vm545_vm11, %v2051_v17, %v544_v54  ;;  %v547_v25 = vsel %vm545_vm11, %v544_v54, %v2051_v17  ;;  %v711_v17 = vld [vmem:[%s2501_s4] sm:$0xff] }
  0xcb   : > { %v550_v26 = vmul.f32 %v2171_v42, %v547_v25  ;;  %v551_v56 = vmul.f32 %v2174_v43, %v546_v55 }
  0xcd   : > { %v650_v60 = vrot.slane %v550_v26, 5  ;;  %v651_v61 = vrot.slane %v551_v56, 5 }
  0xcf   : > { %v691_v62 = vsel %vm690_vm8, %v534_v57, %v650_v60  ;;  %v692_v63 = vsel %vm690_vm8, %v535_v58, %v651_v61  ;;  %v949_v58 = vld [vmem:[%s2504_s7] sm:$0xff]  ;;  %vm1016_vm8 = vcmask 64512  }
  0xd0   : > { %v694_v1 = vsel %vm693_vm14, %v691_v62, %v656_v59  ;;  %v695_v2 = vsel %vm693_vm14, %v692_v63, %v657_v0 }
  0xd1   : > { %753 = vmatpush.msra.mxu0 %v694_v1  ;;  %776 = vmatpush.msra.mxu1 %v695_v2  ;;  %v723_v39 = vpop.permute.xlu1 %722 }
  0xd2   : > { %1830 = vmatmul.msk.f32.vlgmr.msra.gmra.mxu0 %vm725_vm15, %v711_v17  ;;  %1833 = vmatmul.msk.f32.vlgmr.msra.gmra.mxu1 %vm725_vm15, %v711_v17 }
  0xda   : > { %1831 = vmatmul.msk.f32.gmra.mxu0 %vm725_vm15, %v712_v3  ;;  %1834 = vmatmul.msk.f32.gmra.mxu1 %vm725_vm15, %v712_v3 }
 0x14f   : > { %v2212_v4 = vpop.f32.mrf.mxu0  ;;  %v2214_v7 = vpop.f32.mrf.mxu1 }
 0x157   : > { %v758_v59 = vpop.f32.mrf.mxu0  ;;  %v781_v40 = vpop.f32.mrf.mxu1 }
 0x158   : > { %v782_v0 = vadd.f32 %v781_v40, %v723_v39  ;;  %v759_v8 = vadd.f32 %v758_v59, %v723_v39 }
 0x15a   : > { %v786_v10 = vrot.slane %v782_v0, 4 }
 0x15c   : > { %v787_v11 = vsel %vm699_vm10, %v759_v8, %v786_v10 }
 0x15d   : > { %v789_v12 = vadd.f32 %v787_v11, %v2220_v9 }
 0x15f   : > { %791 = vst [vmem:[#allocation1] ss:$2 sm:$0xff] %v789_v12 }
 0x166   : > { %v792_v13 = vld.sshfl [vmem:[#allocation1] sm:$0xff pattern:$0x75316420]  ;;  %v793_v14 = vld.sshfl [vmem:[#allocation1 + $0x8] sm:$0xff pattern:$0x75316420] }
 0x167   : > { %796 = vrot.lane.b32.xlu2 %v792_v13, %s1934_s26  ;;  %804 = vst [vmem:[#allocation1] ss:$2 sm:$0xff] %v789_v12 }
 0x16e   : > { %v806_v15 = vld.sshfl [vmem:[#allocation1 + $0x8] sm:$0xff pattern:$0x75316420]  ;;  %v805_v16 = vld.sshfl [vmem:[#allocation1] sm:$0xff pattern:$0x75316420] }
 0x16f   : > { %811 = vrot.lane.b32.xlu1 %v806_v15, %s1927_s19  ;;  %809 = vrot.lane.b32.xlu0 %v805_v16, %s1927_s19  ;;  %817 = vst [vmem:[#allocation1] ss:$2 sm:$0xff] %v789_v12 }
 0x176   : > { %v819_v18 = vld.sshfl [vmem:[#allocation1 + $0x8] sm:$0xff pattern:$0x75316420]  ;;  %v818_v19 = vld.sshfl [vmem:[#allocation1] sm:$0xff pattern:$0x75316420] }
 0x177   : > { %824 = vrot.lane.b32.xlu2 %v819_v18, %s1928_s20  ;;  %822 = vrot.lane.b32.xlu1 %v818_v19, %s1928_s20  ;;  %830 = vst [vmem:[#allocation1] ss:$2 sm:$0xff] %v789_v12 }
 0x17e   : > { %v831_v20 = vld.sshfl [vmem:[#allocation1] sm:$0xff pattern:$0x75316420]  ;;  %v832_v21 = vld.sshfl [vmem:[#allocation1 + $0x8] sm:$0xff pattern:$0x75316420] }
 0x17f   : > { %843 = vst [vmem:[#allocation1] ss:$2 sm:$0xff] %v789_v12 }
 0x186   : > { %v845_v22 = vld.sshfl [vmem:[#allocation1 + $0x8] sm:$0xff pattern:$0x75316420]  ;;  %v844_v23 = vld.sshfl [vmem:[#allocation1] sm:$0xff pattern:$0x75316420] }
 0x187   : > { %850 = vrot.lane.b32.xlu0 %v845_v22, %s1930_s22  ;;  %848 = vrot.lane.b32.xlu2 %v844_v23, %s1930_s22  ;;  %856 = vst [vmem:[#allocation1] ss:$2 sm:$0xff] %v789_v12 }
 0x18e   : > { %v858_v27 = vld.sshfl [vmem:[#allocation1 + $0x8] sm:$0xff pattern:$0x75316420]  ;;  %v857_v28 = vld.sshfl [vmem:[#allocation1] sm:$0xff pattern:$0x75316420] }
 0x18f   : > { %863 = vrot.lane.b32.xlu2 %v858_v27, %s1931_s23  ;;  %861 = vrot.lane.b32.xlu1 %v857_v28, %s1931_s23  ;;  %869 = vst [vmem:[#allocation1] ss:$2 sm:$0xff] %v789_v12 }
 0x196   : > { %v871_v29 = vld.sshfl [vmem:[#allocation1 + $0x8] sm:$0xff pattern:$0x75316420]  ;;  %v870_v32 = vld.sshfl [vmem:[#allocation1] sm:$0xff pattern:$0x75316420] }
 0x197   : > { %876 = vrot.lane.b32.xlu0 %v871_v29, %s1932_s24  ;;  %874 = vrot.lane.b32.xlu2 %v870_v32, %s1932_s24  ;;  %882 = vst [vmem:[#allocation1] ss:$2 sm:$0xff] %v789_v12 }
 0x19e   : > { %v884_v33 = vld.sshfl [vmem:[#allocation1 + $0x8] sm:$0xff pattern:$0x75316420]  ;;  %v883_v44 = vld.sshfl [vmem:[#allocation1] sm:$0xff pattern:$0x75316420] }
 0x19f   : > { %837 = vrot.lane.b32.xlu2 %v832_v21, %s1929_s21  ;;  %889 = vrot.lane.b32.xlu1 %v884_v33, %s2512_s25  ;;  %913 = vst [vmem:[#allocation1] ss:$2 sm:$0xff] %v789_v12 }
 0x1a0   : > { %887 = vrot.lane.b32.xlu0 %v883_v44, %s2512_s25  ;;  %s1938_s25 = smov 104  }
 0x1a6   : > { %v914_v47 = vld.sshfl [vmem:[#allocation1] sm:$0xff pattern:$0x75316420]  ;;  %v915_v50 = vld.sshfl [vmem:[#allocation1 + $0x8] sm:$0xff pattern:$0x75316420] }
 0x1a7   : > { %835 = vrot.lane.b32.xlu1 %v831_v20, %s1929_s21  ;;  %1671 = vst [vmem:[#allocation1] ss:$2 sm:$0xff] %v2220_v9 }
 0x1a8   : > { %798 = vrot.lane.b32.xlu0 %v793_v14, %s1934_s26 }
 0x1af   : > { %717 = vperm.xlu1 %1906, %v713_v51  }
 0x1b0   : > { %952 = vperm.xlu0 %1907, %v949_v58  }
 0x1c1   : > { %v2244_v52 = vpop.permute.xlu2 %796 }
 0x1d1   : > { %v825_v53 = vpop.permute.xlu2 %824 }
 0x1e1   : > { %v812_v54 = vpop.permute.xlu1 %811  ;;  %v849_v55 = vpop.permute.xlu2 %848 }
 0x1e2   : > { %v810_v25 = vpop.permute.xlu0 %809 }
 0x1e3   : > { %v813_v23 = vsel %vm545_vm11, %v810_v25, %v812_v54  ;;  %v814_v29 = vsel %vm545_vm11, %v812_v54, %v810_v25 }
 0x1e9   : > { %v823_v26 = vpop.permute.xlu1 %822  ;;  %v864_v56 = vpop.permute.xlu2 %863 }
 0x1ea   : > { %v826_v32 = vsel %vm561_vm0, %v823_v26, %v825_v53  ;;  %v827_v51 = vsel %vm561_vm0, %v825_v53, %v823_v26 }
 0x1eb   : > { %v829_v53 = vmul.f32 %v826_v32, %v2070_v31 }
 0x1f1   : > { %v875_v17 = vpop.permute.xlu2 %874 }
 0x1f9   : > { %v851_v57 = vpop.permute.xlu0 %850  ;;  %v838_v26 = vpop.permute.xlu2 %837 }
 0x1fa   : > { %v852_v62 = vsel %vm593_vm2, %v849_v55, %v851_v57  ;;  %v853_v63 = vsel %vm593_vm2, %v851_v57, %v849_v55  ;;  %v815_v57 = vmul.f32 %v814_v29, %v2171_v42 }
 0x1fb   : > { %v854_v59 = vmul.f32 %v852_v62, %v2085_v36  ;;  %v855_v40 = vmul.f32 %v853_v63, %v2101_v41 }
 0x1fd   : > { %v920_v12 = vrot.slane %v854_v59, 6  ;;  %v921_v13 = vrot.slane %v855_v40, 6 }
 0x1ff   : > { %v942_v33 = vsel %vm705_vm6, %v914_v47, %v920_v12  ;;  %v943_v44 = vsel %vm705_vm6, %v915_v50, %v921_v13  ;;  %v816_v47 = vmul.f32 %v813_v23, %v2174_v43  ;;  %v828_v50 = vmul.f32 %v827_v51, %v2067_v30 }
 0x201   : > { %v862_v60 = vpop.permute.xlu1 %861 }
 0x202   : > { %v865_v1 = vsel %vm609_vm3, %v862_v60, %v864_v56  ;;  %v866_v2 = vsel %vm609_vm3, %v864_v56, %v862_v60 }
 0x203   : > { %v867_v0 = vmul.f32 %v865_v1, %v2089_v37  ;;  %v868_v8 = vmul.f32 %v866_v2, %v2092_v38 }
 0x205   : > { %v926_v15 = vrot.slane %v867_v0, 4  ;;  %v927_v16 = vrot.slane %v868_v8, 4  ;;  %v903_v0 = vrot.slane %v828_v50, 4  ;;  %v904_v8 = vrot.slane %v829_v53, 4 }
 0x207   : > { %v944_v55 = vsel %vm699_vm10, %v942_v33, %v926_v15  ;;  %v945_v56 = vsel %vm699_vm10, %v943_v44, %v927_v16 }
 0x209   : > { %v877_v61 = vpop.permute.xlu0 %876 }
 0x20a   : > { %v878_v3 = vsel %vm625_vm4, %v875_v17, %v877_v61  ;;  %v879_v39 = vsel %vm625_vm4, %v877_v61, %v875_v17 }
 0x20b   : > { %v880_v10 = vmul.f32 %v878_v3, %v2109_v45  ;;  %v881_v11 = vmul.f32 %v879_v39, %v2112_v46  ;;  %v897_v3 = vrot.slane %v815_v57, 6  ;;  %v898_v39 = vrot.slane %v816_v47, 6 }
 0x20d   : > { %v932_v19 = vrot.slane %v880_v10, 2  ;;  %v933_v20 = vrot.slane %v881_v11, 2 }
 0x20f   : > { %v946_v54 = vsel %vm693_vm14, %v944_v55, %v932_v19  ;;  %v947_v25 = vsel %vm693_vm14, %v945_v56, %v933_v20  ;;  %v1010_v19 = vld [vmem:[%s2506_s9] sm:$0xff] }
 0x210   : > { %v2322_v20 = vld [vmem:[%s2507_s10] sm:$0xff]  ;;  %1013 = vperm.xlu2 %1908, %v1010_v19  }
 0x211   : > { %v890_v14 = vpop.permute.xlu1 %889  ;;  %1124 = vrot.lane.b32.xlu0 %v2322_v20, %s1936_s28 }
 0x212   : > { %v888_v18 = vpop.permute.xlu0 %887 }
 0x213   : > { %v891_v21 = vsel %vm641_vm5, %v888_v18, %v890_v14  ;;  %v892_v22 = vsel %vm641_vm5, %v890_v14, %v888_v18 }
 0x214   : > { %v893_v27 = vmul.f32 %v2143_v5, %v891_v21  ;;  %v894_v28 = vmul.f32 %v2148_v6, %v892_v22 }
 0x216   : > { %1835 = vmatpush.msk.msrb.mxu0 %vm705_vm6, %v893_v27  ;;  %1837 = vmatpush.msk.msrb.mxu1 %vm705_vm6, %v894_v28 }
 0x218   : > { %979 = vmatpush.msrb.mxu0 %v946_v54  ;;  %999 = vmatpush.msrb.mxu1 %v947_v25  ;;  %v1007_v54 = vld [vmem:[%s2505_s8] sm:$0xff] }
 0x219   : > { %v836_v58 = vpop.permute.xlu1 %835 }
 0x21a   : > { %v839_v60 = vsel %vm577_vm1, %v836_v58, %v838_v26  ;;  %v840_v61 = vsel %vm577_vm1, %v838_v26, %v836_v58  ;;  %v799_v62 = vpop.permute.xlu0 %798  ;;  %v2339_v26 = vld [vmem:[%s2507_s10 + $0x8] sm:$0x3] }
 0x21b   : > { %v841_v63 = vmul.f32 %v840_v61, %v2078_v34  ;;  %v842_v17 = vmul.f32 %v839_v60, %v2081_v35  ;;  %v800_v1 = vsel %vm529_vm13, %v2244_v52, %v799_v62  ;;  %v801_v2 = vsel %vm529_vm13, %v799_v62, %v2244_v52  ;;  %v948_v52 = vld [vmem:[%s2503_s6] sm:$0xff]  ;;  %v1641_v61 = vld [vmem:[%s2508_s11 + $0x8] sm:$0x3] }
 0x21c   : > { %v802_v59 = vmul.f32 %v801_v2, %v2179_v48  ;;  %v803_v40 = vmul.f32 %v800_v1, %v2182_v49  ;;  %v1640_v60 = vld [vmem:[%s2508_s11] sm:$0xff] }
 0x21d   : > { %v909_v10 = vrot.slane %v841_v63, 2  ;;  %v910_v11 = vrot.slane %v842_v17, 2  ;;  %v1656_v62 = vld [vmem:[%s2509_s12] sm:$0x3] }
 0x21e   : > { %v936_v12 = vsel %vm705_vm6, %v802_v59, %v897_v3  ;;  %v937_v13 = vsel %vm705_vm6, %v803_v40, %v898_v39 }
 0x21f   : > { %v938_v14 = vsel %vm699_vm10, %v936_v12, %v903_v0  ;;  %v939_v15 = vsel %vm699_vm10, %v937_v13, %v904_v8 }
 0x220   : > { %v940_v16 = vsel %vm693_vm14, %v938_v14, %v909_v10  ;;  %v941_v18 = vsel %vm693_vm14, %v939_v15, %v910_v11 }
 0x221   : > { %980 = vmatpush.msrb.mxu0 %v940_v16  ;;  %1000 = vmatpush.msrb.mxu1 %v941_v18  ;;  %v718_v22 = vpop.permute.xlu1 %717 }
 0x222   : > { %1836 = vmatmul.msk.f32.vlgmr.msrb.gmra.mxu0 %vm955_vm7, %v948_v52  ;;  %1838 = vmatmul.msk.f32.vlgmr.msrb.gmra.mxu1 %vm955_vm7, %v948_v52  ;;  %v953_v21 = vpop.permute.xlu0 %952  ;;  %v756_v32 = vadd.f32 %v2212_v4, %v718_v22  ;;  %v779_v33 = vadd.f32 %v2214_v7, %v718_v22 }
 0x26a   : > { %v1014_v25 = vpop.permute.xlu2 %1013 }
 0x283   : > { %v1125_v58 = vpop.permute.xlu0 %1124 }
 0x29f   : > { %v982_v23 = vpop.f32.mrf.mxu0  ;;  %v1002_v27 = vpop.f32.mrf.mxu1 }
 0x2a0   : > { %v983_v28 = vadd.f32 %v982_v23, %v953_v21  ;;  %v1003_v29 = vadd.f32 %v1002_v27, %v953_v21 }
 0x2a2   : > { %v1005_v44 = vmax.f32 %v983_v28, 0.0  ;;  %v1006_v51 = vmax.f32 %v1003_v29, 0.0 }
 0x2a4   : > { %v1008_v55 = vadd.f32 %v1005_v44, %v756_v32  ;;  %v1009_v56 = vadd.f32 %v1006_v51, %v779_v33 }
 0x2a6   : > { %1035 = vmatpush.msra.mxu2 %v1008_v55  ;;  %1055 = vmatpush.msra.mxu3 %v1009_v56 }
 0x2a7   : > { %1839 = vmatmul.msk.f32.vlgmr.msra.gmra.mxu2 %vm1016_vm8, %v1007_v54  ;;  %1840 = vmatmul.msk.f32.vlgmr.msra.gmra.mxu3 %vm1016_vm8, %v1007_v54 }
 0x32a   : > { %v1037_v57 = vpop.f32.mrf.mxu2  ;;  %v1057_v4 = vpop.f32.mrf.mxu3 }
 0x32b   : > { %v1038_v47 = vadd.f32 %v1037_v57, %v1014_v25  ;;  %v1058_v7 = vadd.f32 %v1057_v4, %v1014_v25 }
 0x32d   : > { %v1060_v50 = vmax.f32 %v1038_v47, 0.0  ;;  %v1061_v53 = vmax.f32 %v1058_v7, 0.0 }
 0x32f   : > { %1066 = vrot.lane.b32.xlu2 %v1061_v53, %s1934_s26  ;;  %1170 = vmatpush.msra.mxu1 %v1061_v53 }
 0x330   : > { %1178 = vrot.lane.b32.xlu0 %v1060_v50, %s1927_s19  ;;  %1064 = vrot.lane.b32.xlu1 %v1060_v50, %s1934_s26  ;;  %s1939_s26 = smov 80  }
 0x331   : > { %1147 = vmatpush.msra.mxu0 %v1060_v50  ;;  %1847 = vmatmul.msk.f32.vlgmr.msra.gmra.mxu1 %vm1016_vm8, %v1125_v58 }
 0x332   : > { %1845 = vmatmul.msk.f32.vlgmr.msra.gmra.mxu0 %vm1016_vm8, %v1125_v58 }
 0x337   : > { %1186 = vrot.lane.b32.xlu2 %v2322_v20, %s1937_s27 }
 0x338   : > { %1320 = vrot.lane.b32.xlu0 %v2339_v26, %s1938_s25  ;;  %1188 = vrot.lane.b32.xlu1 %v2339_v26, %s1937_s27 }
 0x33f   : > { %1126 = vrot.lane.b32.xlu2 %v2339_v26, %s1936_s28  ;;  %s510_s28 = scalar_lea.vmem %s2511_s14, %s2516_s30 }
 0x340   : > { %1310 = vrot.lane.b32.xlu0 %v1060_v50, %s1929_s21  ;;  %1180 = vrot.lane.b32.xlu1 %v1061_v53, %s1927_s19  ;;  %s1940_s19 = smov 88  }
 0x347   : > { %1252 = vrot.lane.b32.xlu2 %v2322_v20, %s1932_s24 }
 0x348   : > { %1246 = vrot.lane.b32.xlu0 %v1061_v53, %s1928_s20  ;;  %1318 = vrot.lane.b32.xlu1 %v2322_v20, %s1938_s25 }
 0x34f   : > { %1244 = vrot.lane.b32.xlu2 %v1060_v50, %s1928_s20  ;;  %s2514_s20 = smov 111  }
 0x350   : > { %1450 = vrot.lane.b32.xlu0 %v2322_v20, %s1939_s26  ;;  %1312 = vrot.lane.b32.xlu1 %v1061_v53, %s1929_s21  ;;  %s1941_s21 = smov 72  }
 0x357   : > { %1452 = vrot.lane.b32.xlu2 %v2339_v26, %s1939_s26  ;;  %s507_s26 = scalar_lea.vmem %s2510_s13, %s2029_s15 }
 0x358   : > { %1444 = vrot.lane.b32.xlu0 %v1061_v53, %s1931_s23  ;;  %1254 = vrot.lane.b32.xlu1 %v2339_v26, %s1932_s24 }
 0x35f   : > { %1442 = vrot.lane.b32.xlu2 %v1060_v50, %s1931_s23 }
 0x360   : > { %1386 = vrot.lane.b32.xlu0 %v2339_v26, %s1940_s19  ;;  %1384 = vrot.lane.b32.xlu1 %v2322_v20, %s1940_s19 }
 0x367   : > { %1378 = vrot.lane.b32.xlu2 %v1061_v53, %s1930_s22 }
 0x368   : > { %1508 = vrot.lane.b32.xlu0 %v1060_v50, %s1932_s24  ;;  %1376 = vrot.lane.b32.xlu1 %v1060_v50, %s1930_s22 }
 0x36f   : > { %1576 = vrot.lane.b32.xlu2 %v1061_v53, %s2514_s20 }
 0x370   : > { %1516 = vrot.lane.b32.xlu0 %v2322_v20, %s1941_s21  ;;  %1574 = vrot.lane.b32.xlu1 %v1060_v50, %s2514_s20 }
 0x377   : > { %1582 = vrot.lane.b32.xlu2 %v2322_v20, %s1942_s16 }
 0x378   : > { %1644 = vperm.xlu0 %1907, %v1640_v60   ;;  %1510 = vrot.lane.b32.xlu1 %v1061_v53, %s1932_s24 }
 0x37f   : > { %1518 = vrot.lane.b32.xlu2 %v2339_v26, %s1941_s21  ;;  %s502_s21 = scalar_lea.vmem %s2499_s2, %s2516_s30 }
 0x380   : > { %1649 = vperm.xlu0 %1907, %v1641_v61   ;;  %1584 = vrot.lane.b32.xlu1 %v2339_v26, %s1942_s16 }
 0x388   : > { %1661 = vperm.xlu1 %1906, %v1656_v62  }
 0x389   : > { %v1067_v63 = vpop.permute.xlu2 %1066 }
 0x391   : > { %v1187_v17 = vpop.permute.xlu2 %1186 }
 0x399   : > { %v1127_v1 = vpop.permute.xlu2 %1126 }
 0x39a   : > { %1846 = vmatmul.msk.f32.gmra.mxu0 %vm1016_vm8, %v1127_v1  ;;  %1848 = vmatmul.msk.f32.gmra.mxu1 %vm1016_vm8, %v1127_v1 }
 0x3a1   : > { %v1253_v11 = vpop.permute.xlu2 %1252 }
 0x3a2   : > { %v1179_v2 = vpop.permute.xlu0 %1178  ;;  %v1065_v3 = vpop.permute.xlu1 %1064 }
 0x3a3   : > { %v1068_v39 = vsel %vm529_vm13, %v1065_v3, %v1067_v63  ;;  %v1069_v59 = vsel %vm529_vm13, %v1067_v63, %v1065_v3 }
 0x3a4   : > { %v1070_v40 = vmul.f32 %v1069_v59, %v2179_v48  ;;  %v1071_v0 = vmul.f32 %v1068_v39, %v2182_v49 }
 0x3a6   : > { %1093 = vmatpush.msrb.mxu2 %v1070_v40  ;;  %1116 = vmatpush.msrb.mxu3 %v1071_v0 }
 0x3a7   : > { %1841 = vmatmul.msk.f32.vlgmr.msrb.gmra.mxu2 %vm1016_vm8, %v2322_v20  ;;  %1843 = vmatmul.msk.f32.vlgmr.msrb.gmra.mxu3 %vm1016_vm8, %v2322_v20 }
 0x3a9   : > { %v1245_v52 = vpop.permute.xlu2 %1244 }
 0x3aa   : > { %v1321_v8 = vpop.permute.xlu0 %1320  ;;  %v1189_v10 = vpop.permute.xlu1 %1188 }
 0x3ae   : > { %v1172_v40 = vpop.f32.mrf.mxu1 }
 0x3af   : > { %1842 = vmatmul.msk.f32.gmra.mxu2 %vm1016_vm8, %v2339_v26  ;;  %1844 = vmatmul.msk.f32.gmra.mxu3 %vm1016_vm8, %v2339_v26  ;;  %v1149_v59 = vpop.f32.mrf.mxu0 }
 0x3b2   : > { %v1311_v48 = vpop.permute.xlu0 %1310  ;;  %v1181_v12 = vpop.permute.xlu1 %1180 }
 0x3b3   : > { %v1182_v49 = vsel %vm545_vm11, %v1179_v2, %v1181_v12  ;;  %v1183_v13 = vsel %vm545_vm11, %v1181_v12, %v1179_v2 }
 0x3b4   : > { %v1184_v14 = vmul.f32 %v1183_v13, %v2171_v42  ;;  %v1185_v15 = vmul.f32 %v1182_v49, %v2174_v43  ;;  %v1453_v43 = vpop.permute.xlu2 %1452 }
 0x3b6   : > { %1209 = vmatpush.msra.mxu2 %v1184_v14  ;;  %1232 = vmatpush.msra.mxu3 %v1185_v15 }
 0x3b7   : > { %1849 = vmatmul.msk.f32.vlgmr.msra.gmra.mxu2 %vm1016_vm8, %v1187_v17  ;;  %1851 = vmatmul.msk.f32.vlgmr.msra.gmra.mxu3 %vm1016_vm8, %v1187_v17 }
 0x3ba   : > { %v1247_v16 = vpop.permute.xlu0 %1246  ;;  %v1319_v18 = vpop.permute.xlu1 %1318 }
 0x3bb   : > { %v1248_v19 = vsel %vm561_vm0, %v1245_v52, %v1247_v16  ;;  %v1249_v20 = vsel %vm561_vm0, %v1247_v16, %v1245_v52  ;;  %vm1715_vm0 = vcmask 0  }
 0x3bc   : > { %v1250_v21 = vmul.f32 %v1249_v20, %v2067_v30  ;;  %v1251_v42 = vmul.f32 %v1248_v19, %v2070_v31  ;;  %v1443_v29 = vpop.permute.xlu2 %1442 }
 0x3be   : > { %1275 = vmatpush.msrb.mxu0 %v1250_v21  ;;  %1298 = vmatpush.msrb.mxu1 %v1251_v42 }
 0x3bf   : > { %1850 = vmatmul.msk.f32.gmra.mxu2 %vm1016_vm8, %v1189_v10  ;;  %1852 = vmatmul.msk.f32.gmra.mxu3 %vm1016_vm8, %v1189_v10 }
 0x3c0   : > { %1853 = vmatmul.msk.f32.vlgmr.msrb.gmra.mxu0 %vm1016_vm8, %v1253_v11  ;;  %1855 = vmatmul.msk.f32.vlgmr.msrb.gmra.mxu1 %vm1016_vm8, %v1253_v11 }
 0x3c2   : > { %v1451_v22 = vpop.permute.xlu0 %1450  ;;  %v1313_v23 = vpop.permute.xlu1 %1312 }
 0x3c3   : > { %v1314_v27 = vsel %vm577_vm1, %v1311_v48, %v1313_v23  ;;  %v1315_v30 = vsel %vm577_vm1, %v1313_v23, %v1311_v48 }
 0x3c4   : > { %v1316_v31 = vmul.f32 %v1315_v30, %v2078_v34  ;;  %v1317_v28 = vmul.f32 %v1314_v27, %v2081_v35  ;;  %v1379_v56 = vpop.permute.xlu2 %1378  ;;  %v2469_v27 = vld.sshfl [vmem:[#allocation1] sm:$0xff pattern:$0x75316420]  ;;  %v2471_v30 = vld.sshfl [vmem:[#allocation1 + $0x8] sm:$0xff pattern:$0x75316420] }
 0x3c5   : > { %1682 = vst [vmem:[#allocation1] ss:$2 sm:$0xff] %v2220_v9 }
 0x3c6   : > { %1341 = vmatpush.msrb.mxu2 %v1316_v31  ;;  %1364 = vmatpush.msrb.mxu3 %v1317_v28 }
 0x3c7   : > { %1857 = vmatmul.msk.f32.vlgmr.msrb.gmra.mxu2 %vm1016_vm8, %v1319_v18  ;;  %1859 = vmatmul.msk.f32.vlgmr.msrb.gmra.mxu3 %vm1016_vm8, %v1319_v18 }
 0x3ca   : > { %v1445_v32 = vpop.permute.xlu0 %1444  ;;  %v1255_v33 = vpop.permute.xlu1 %1254 }
 0x3cb   : > { %v1446_v44 = vsel %vm609_vm3, %v1443_v29, %v1445_v32  ;;  %v1447_v51 = vsel %vm609_vm3, %v1445_v32, %v1443_v29  ;;  %1854 = vmatmul.msk.f32.gmra.mxu0 %vm1016_vm8, %v1255_v33  ;;  %1856 = vmatmul.msk.f32.gmra.mxu1 %vm1016_vm8, %v1255_v33 }
 0x3cc   : > { %v1448_v34 = vmul.f32 %v1446_v44, %v2089_v37  ;;  %v1449_v35 = vmul.f32 %v1447_v51, %v2092_v38  ;;  %v1577_v47 = vpop.permute.xlu2 %1576 }
 0x3ce   : > { %1473 = vmatpush.msra.mxu2 %v1448_v34  ;;  %1496 = vmatpush.msra.mxu3 %v1449_v35 }
 0x3cf   : > { %1858 = vmatmul.msk.f32.gmra.mxu2 %vm1016_vm8, %v1321_v8  ;;  %1860 = vmatmul.msk.f32.gmra.mxu3 %vm1016_vm8, %v1321_v8 }
 0x3d2   : > { %v1385_v55 = vpop.permute.xlu1 %1384  ;;  %v1387_v54 = vpop.permute.xlu0 %1386 }
 0x3d4   : > { %v1583_v58 = vpop.permute.xlu2 %1582 }
 0x3d7   : > { %1865 = vmatmul.msk.f32.vlgmr.msra.gmra.mxu2 %vm1016_vm8, %v1451_v22  ;;  %1867 = vmatmul.msk.f32.vlgmr.msra.gmra.mxu3 %vm1016_vm8, %v1451_v22 }
 0x3da   : > { %v1377_v25 = vpop.permute.xlu1 %1376  ;;  %v1509_v53 = vpop.permute.xlu0 %1508 }
 0x3db   : > { %v1380_v57 = vsel %vm593_vm2, %v1377_v25, %v1379_v56  ;;  %v1381_v37 = vsel %vm593_vm2, %v1379_v56, %v1377_v25 }
 0x3dc   : > { %v1382_v38 = vmul.f32 %v1380_v57, %v2085_v36  ;;  %v1383_v4 = vmul.f32 %v1381_v37, %v2101_v41  ;;  %v1519_v1 = vpop.permute.xlu2 %1518 }
 0x3de   : > { %1407 = vmatpush.msra.mxu0 %v1382_v38  ;;  %1430 = vmatpush.msra.mxu1 %v1383_v4 }
 0x3df   : > { %1861 = vmatmul.msk.f32.vlgmr.msra.gmra.mxu0 %vm1016_vm8, %v1385_v55  ;;  %1863 = vmatmul.msk.f32.vlgmr.msra.gmra.mxu1 %vm1016_vm8, %v1385_v55 }
 0x3e0   : > { %1866 = vmatmul.msk.f32.gmra.mxu2 %vm1016_vm8, %v1453_v43  ;;  %1868 = vmatmul.msk.f32.gmra.mxu3 %vm1016_vm8, %v1453_v43 }
 0x3e2   : > { %v1575_v7 = vpop.permute.xlu1 %1574  ;;  %v1517_v63 = vpop.permute.xlu0 %1516 }
 0x3e3   : > { %v1578_v50 = vsel %vm641_vm5, %v1575_v7, %v1577_v47  ;;  %v1579_v36 = vsel %vm641_vm5, %v1577_v47, %v1575_v7 }
 0x3e4   : > { %v1580_v41 = vmul.f32 %v2143_v5, %v1578_v50  ;;  %v1581_v26 = vmul.f32 %v2148_v6, %v1579_v36 }
 0x3e6   : > { %1605 = vmatpush.msrb.mxu2 %v1580_v41  ;;  %1628 = vmatpush.msrb.mxu3 %v1581_v26 }
 0x3e7   : > { %1862 = vmatmul.msk.f32.gmra.mxu0 %vm1016_vm8, %v1387_v54  ;;  %1864 = vmatmul.msk.f32.gmra.mxu1 %vm1016_vm8, %v1387_v54 }
 0x3e8   : > { %1873 = vmatmul.msk.f32.vlgmr.msrb.gmra.mxu2 %vm1016_vm8, %v1583_v58  ;;  %1875 = vmatmul.msk.f32.vlgmr.msrb.gmra.mxu3 %vm1016_vm8, %v1583_v58 }
 0x3ea   : > { %v1511_v60 = vpop.permute.xlu1 %1510  ;;  %v1645_v36 = vpop.permute.xlu0 %1644 }
 0x3eb   : > { %v1512_v61 = vsel %vm625_vm4, %v1509_v53, %v1511_v60  ;;  %v1513_v5 = vsel %vm625_vm4, %v1511_v60, %v1509_v53 }
 0x3ec   : > { %v1514_v6 = vmul.f32 %v1512_v61, %v2109_v45  ;;  %v1515_v62 = vmul.f32 %v1513_v5, %v2112_v46 }
 0x3ee   : > { %1539 = vmatpush.msrb.mxu0 %v1514_v6  ;;  %1562 = vmatpush.msrb.mxu1 %v1515_v62 }
 0x3ef   : > { %1869 = vmatmul.msk.f32.vlgmr.msrb.gmra.mxu0 %vm1016_vm8, %v1517_v63  ;;  %1871 = vmatmul.msk.f32.vlgmr.msrb.gmra.mxu1 %vm1016_vm8, %v1517_v63 }
 0x3f2   : > { %v1585_v17 = vpop.permute.xlu1 %1584 }
 0x3f3   : > { %1874 = vmatmul.msk.f32.gmra.mxu2 %vm1016_vm8, %v1585_v17  ;;  %1876 = vmatmul.msk.f32.gmra.mxu3 %vm1016_vm8, %v1585_v17 }
 0x3f7   : > { %1870 = vmatmul.msk.f32.gmra.mxu0 %vm1016_vm8, %v1519_v1  ;;  %1872 = vmatmul.msk.f32.gmra.mxu1 %vm1016_vm8, %v1519_v1 }
 0x417   : > { %v1152_v10 = vpop.f32.mrf.mxu0  ;;  %v1175_v11 = vpop.f32.mrf.mxu1 }
 0x42a   : > { %v1095_v24 = vpop.f32.mrf.mxu2  ;;  %v1118_v45 = vpop.f32.mrf.mxu3 }
 0x42b   : > { %v1150_v42 = vadd.f32 %v1149_v59, %v1095_v24  ;;  %v1173_v43 = vadd.f32 %v1172_v40, %v1118_v45  ;;  %v1662_v24 = vpop.permute.xlu1 %1661 }
 0x432   : > { %v1098_v46 = vpop.f32.mrf.mxu2  ;;  %v1121_v2 = vpop.f32.mrf.mxu3 }
 0x433   : > { %v1153_v7 = vadd.f32 %v1152_v10, %v1098_v46  ;;  %v1176_v53 = vadd.f32 %v1175_v11, %v1121_v2 }
 0x43a   : > { %v1211_v3 = vpop.f32.mrf.mxu2  ;;  %v1234_v39 = vpop.f32.mrf.mxu3 }
 0x43b   : > { %v1240_v22 = vadd.f32 %v1211_v3, %v1150_v42  ;;  %v1241_v23 = vadd.f32 %v1234_v39, %v1173_v43 }
 0x43d   : > { %v1277_v49 = vpop.f32.mrf.mxu0  ;;  %v1300_v13 = vpop.f32.mrf.mxu1 }
 0x43e   : > { %v1306_v31 = vadd.f32 %v1277_v49, %v1240_v22  ;;  %v1307_v28 = vadd.f32 %v1300_v13, %v1241_v23 }
 0x442   : > { %v1214_v0 = vpop.f32.mrf.mxu2  ;;  %v1237_v8 = vpop.f32.mrf.mxu3 }
 0x443   : > { %v1242_v41 = vadd.f32 %v1214_v0, %v1153_v7  ;;  %v1243_v60 = vadd.f32 %v1237_v8, %v1176_v53 }
 0x448   : > { %v1280_v52 = vpop.f32.mrf.mxu0  ;;  %v1303_v16 = vpop.f32.mrf.mxu1 }
 0x449   : > { %v1308_v61 = vadd.f32 %v1280_v52, %v1242_v41  ;;  %v1309_v5 = vadd.f32 %v1303_v16, %v1243_v60  ;;  %v1674_v52 = vrot.slane %v2469_v27, 2 }
 0x44a   : > { %v1343_v48 = vpop.f32.mrf.mxu2  ;;  %v1366_v12 = vpop.f32.mrf.mxu3 }
 0x44b   : > { %v1372_v51 = vadd.f32 %v1343_v48, %v1306_v31  ;;  %v1373_v34 = vadd.f32 %v1366_v12, %v1307_v28 }
 0x452   : > { %v1346_v14 = vpop.f32.mrf.mxu2  ;;  %v1369_v15 = vpop.f32.mrf.mxu3 }
 0x453   : > { %v1374_v6 = vadd.f32 %v1346_v14, %v1308_v61  ;;  %v1375_v62 = vadd.f32 %v1369_v15, %v1309_v5 }
 0x45a   : > { %v1475_v18 = vpop.f32.mrf.mxu2  ;;  %v1498_v19 = vpop.f32.mrf.mxu3 }
 0x45c   : > { %v1409_v20 = vpop.f32.mrf.mxu0  ;;  %v1432_v21 = vpop.f32.mrf.mxu1 }
 0x45d   : > { %v1438_v35 = vadd.f32 %v1409_v20, %v1372_v51  ;;  %v1439_v55 = vadd.f32 %v1432_v21, %v1373_v34  ;;  %v1650_v20 = vpop.permute.xlu0 %1649 }
 0x45f   : > { %v1504_v56 = vadd.f32 %v1475_v18, %v1438_v35  ;;  %v1505_v54 = vadd.f32 %v1498_v19, %v1439_v55  ;;  %v1675_v18 = vrot.slane %v2471_v30, 2 }
 0x463   : > { %v1478_v29 = vpop.f32.mrf.mxu2  ;;  %v1501_v32 = vpop.f32.mrf.mxu3 }
 0x464   : > { %v1412_v33 = vpop.f32.mrf.mxu0  ;;  %v1435_v44 = vpop.f32.mrf.mxu1 }
 0x465   : > { %v1440_v63 = vadd.f32 %v1412_v33, %v1374_v6  ;;  %v1441_v17 = vadd.f32 %v1435_v44, %v1375_v62  ;;  %v1683_v44 = vld.sshfl [vmem:[#allocation1] sm:$0xff pattern:$0x75316420] }
 0x467   : > { %v1506_v59 = vadd.f32 %v1478_v29, %v1440_v63  ;;  %v1507_v0 = vadd.f32 %v1501_v32, %v1441_v17  ;;  %v1684_v29 = vld.sshfl [vmem:[#allocation1 + $0x8] sm:$0xff pattern:$0x75316420] }
 0x46b   : > { %v1607_v25 = vpop.f32.mrf.mxu2  ;;  %v1630_v57 = vpop.f32.mrf.mxu3 }
 0x46c   : > { %v1541_v37 = vpop.f32.mrf.mxu0  ;;  %v1564_v38 = vpop.f32.mrf.mxu1 }
 0x46d   : > { %v1570_v4 = vadd.f32 %v1541_v37, %v1504_v56  ;;  %v1571_v47 = vadd.f32 %v1564_v38, %v1505_v54  ;;  %v1713_v38 = vld [vmem:[%s502_s21] sm:$0x1] }
 0x46f   : > { %v1636_v9 = vadd.f32 %v1607_v25, %v1570_v4  ;;  %v1637_v50 = vadd.f32 %v1630_v57, %v1571_v47 }
 0x471   : > { %v1652_v26 = vadd.f32 %v1645_v36, %v1636_v9  ;;  %v1653_v58 = vadd.f32 %v1645_v36, %v1637_v50 }
 0x473   : > { %1911 = vtanh.f32 %v1652_v26 }
 0x474   : > { %1913 = vtanh.f32 %v1653_v58  ;;  %v1544_v3 = vpop.f32.mrf.mxu0  ;;  %v1567_v2 = vpop.f32.mrf.mxu1 }
 0x475   : > { %v1572_v11 = vadd.f32 %v1544_v3, %v1506_v59  ;;  %v1573_v12 = vadd.f32 %v1567_v2, %v1507_v0 }
 0x476   : > { %v1610_v49 = vpop.f32.mrf.mxu2  ;;  %v1633_v14 = vpop.f32.mrf.mxu3 }
 0x477   : > { %v1638_v15 = vadd.f32 %v1610_v49, %v1572_v11  ;;  %v1639_v16 = vadd.f32 %v1633_v14, %v1573_v12 }
 0x479   : > { %v1912_v1 = vpop.eup %1911  ;;  %v1654_v42 = vadd.f32 %v1650_v20, %v1638_v15  ;;  %v1655_v22 = vadd.f32 %v1650_v20, %v1639_v16 }
 0x47a   : > { %v1914_v45 = vpop.eup %1913  ;;  %v1664_v46 = vmul.f32 %v1912_v1, %v1662_v24 }
 0x47b   : > { %v1665_v39 = vmul.f32 %v1914_v45, %v1662_v24 }
 0x47c   : > { %v1666_v40 = vmul.f32 1.442695, %v1664_v46  ;;  %v1701_v8 = vsel %vm705_vm6, %v1664_v46, 0.0 }
 0x47d   : > { %v1668_v10 = vmul.f32 1.442695, %v1665_v39  ;;  %v1702_v48 = vsel %vm705_vm6, %v1665_v39, 0.0 }
 0x47e   : > { %1915 = vpow2.f32 %v1666_v40  ;;  %v1703_v13 = vadd.f32 %v1702_v48, %v1701_v8 }
 0x47f   : > { %1917 = vpow2.f32 %v1668_v10 }
 0x480   : > { %1704 = vadd.xlane.f32.xlu2 %v1703_v13 }
 0x484   : > { %v1916_v19 = vpop.eup %1915 }
 0x485   : > { %v1918_v21 = vpop.eup %1917  ;;  %v1678_v43 = vmul.f32 %v1916_v19, %v1674_v52 }
 0x486   : > { %v1679_v23 = vmul.f32 %v1918_v21, %v1675_v18 }
 0x487   : > { %v1680_v31 = vadd.f32 %v1678_v43, %v1654_v42 }
 0x488   : > { %v1681_v28 = vadd.f32 %v1679_v23, %v1655_v22 }
 0x489   : > { %v1689_v32 = vrot.slane %v1680_v31, 6 }
 0x48a   : > { %v1690_v33 = vrot.slane %v1681_v28, 6 }
 0x48b   : > { %v1693_v51 = vsel %vm705_vm6, %v1683_v44, %v1689_v32 }
 0x48c   : > { %v1694_v27 = vsel %vm705_vm6, %v1684_v29, %v1690_v33 }
 0x48d   : > { %v1697_v30 = vrot.slane %v1694_v27, 4 }
 0x48f   : > { %v1698_v34 = vsel %vm699_vm10, %v1693_v51, %v1697_v30 }
 0x490   : > { %1700 = vst [vmem:[%s507_s26] sm:$0xff] %v1698_v34 }
 0x4f3   : > { %v1705_v35 = vpop.xlane.xlu2 %1704 }
 0x4f4   : > { %v1706_v55 = vsel %vm705_vm6, %v1705_v35, 0.0 }
 0x4f5   : > { %v1707_v56 = vrot.slane %v1706_v55, 4 }
 0x4f7   : > { %v1708_v54 = vadd.f32 %v1707_v56, %v1706_v55 }
 0x4f9   : > { %v1709_v25 = vrot.slane %v1708_v54, 2 }
 0x4fb   : > { %v1710_v57 = vadd.f32 %v1709_v25, %v1708_v54 }
 0x4fd   : > { %v1711_v37 = vrot.slane %v1710_v57, 1 }
 0x4ff   : > { %v1712_v4 = vadd.f32 %v1711_v37, %v1710_v57 }
 0x501   : > { %v1714_v47 = vadd.f32 %v1713_v38, %v1712_v4 }
 0x503   : > { %1716 = vst.msk [vmem:[%s510_s28] sm:$0x1] %vm1715_vm0, %v1714_v47 }
 0x504 PF: > { %s25_s29 = sadd.s32 1, %s1925_s29  }
 0x505   : > { %p22_p4 = scmp.ge.s32.totalorder %s25_s29, 4  }
 0x507   :  { %24 = sbr.rel (!%p22_p4) target bundleno = 1 (0x1), region = 121 }

</bundles_post_ra>
